<compile_context>
chip_gen: v7x
topology: tpu7x:2x2x1
jax: 0.10.0
libtpu: 0.0.40
codegen_flags: <defaults>
</compile_context>

<pallas_src>
import jax
import jax.numpy as jnp
from jax.experimental import pallas as pl
from jax.experimental.pallas import tpu as pltpu

HIDDEN1 = 400
HIDDEN2 = 300
HIDDEN1_PAD = 512          # 256-aligned: full MXU width on every generation
VALUE_PAD = 128            # layer-3 N pad; same MXU pass count as any N<=128
OUT_ROWS = 8               # sublane-aligned output rows (row 0 holds the value)
TB_MAX = 512               # batch rows per grid step at large B


def _round_up(x, m):
    return (x + m - 1) // m * m


def _default_hidden2_pad():
    """384 (=3*128) on v5e's 128-wide MXU avoids wasted layer-2 N-passes and
    layer-3 K-passes; 512 (256-aligned) on v6e/v7x's 256-wide MXUs."""
    try:
        kind = jax.devices()[0].device_kind.lower()
        if "v5e" in kind or "v5 lite" in kind or "v5lite" in kind:
            return 384
    except Exception:
        pass
    return 512


HIDDEN2_PAD = _default_hidden2_pad()


def _choose_tile(batch):
    """Pick (TB, Bp).  Large tiles amortize per-grid-step overhead; keep the
    grid >= 2 steps when possible so v7x's two TensorCores both get work."""
    bp = _round_up(max(batch, 1), 128)
    if bp <= 128:
        return bp, bp                              # single grid step
    if bp <= 2 * TB_MAX:
        tb = max(128, _round_up(bp // 2, 128))     # exactly 2 steps
    else:
        tb = TB_MAX                                # 512-row tiles
    return tb, _round_up(bp, tb)


def critic_kernel(s_ref, w1_ref, b1_ref, w2_ref, b2_ref, w3_ref, b3_ref, o_ref):
    # Layer 1: (TB, S) @ (S, H1p) + bias, ReLU    (S left unpadded on purpose)
    h1 = jnp.dot(s_ref[...], w1_ref[...], preferred_element_type=jnp.float32)
    h1 = jnp.maximum(h1 + b1_ref[...], 0.0)
    # Layer 2: (TB, H1p) @ (H1p, H2p) + bias, ReLU  -- dominant MXU work
    h2 = jnp.dot(h1, w2_ref[...], preferred_element_type=jnp.float32)
    h2 = jnp.maximum(h2 + b2_ref[...], 0.0)
    # Layer 3 (value head): (TB, H2p) @ (H2p, 128); only column 0 is real.
    v = jnp.dot(h2, w3_ref[...], preferred_element_type=jnp.float32) + b3_ref[...]
    # Lane-dense output: one XLU transpose puts the values on the lane axis
    # (row 0); store an 8-sublane slab so the vst stays fully unmasked.
    vt = v.T                                        # (VALUE_PAD, TB)
    o_ref[...] = vt[:OUT_ROWS, :].astype(o_ref.dtype)


def critic_forward(s, params):
    """s: (B, state_size) f32.  Returns (B, 1) values, matching the PyTorch net."""
    B, S = s.shape
    w1, b1, w2, b2, w3, b3 = (params[k] for k in ("w1", "b1", "w2", "b2", "w3", "b3"))
    H1p, H2p, Vp = w1.shape[1], w2.shape[1], w3.shape[1]

    TB, Bp = _choose_tile(B)
    if Bp != B:
        s = jnp.pad(s, ((0, Bp - B), (0, 0)))
    grid = (Bp // TB,)

    flops = 2 * Bp * (S * H1p + H1p * H2p + H2p * Vp)
    bytes_accessed = 4 * (Bp * S + w1.size + b1.size + w2.size + b2.size
                          + w3.size + b3.size + OUT_ROWS * Bp)

    out = pl.pallas_call(
        critic_kernel,
        out_shape=jax.ShapeDtypeStruct((OUT_ROWS, Bp), jnp.float32),
        grid=grid,
        in_specs=[
            pl.BlockSpec((TB, S), lambda i: (i, 0)),   # batch-tiled activations
            # Constant index_maps: weights/biases stay VMEM-resident.
            pl.BlockSpec(w1.shape, lambda i: (0, 0)),
            pl.BlockSpec(b1.shape, lambda i: (0, 0)),
            pl.BlockSpec(w2.shape, lambda i: (0, 0)),
            pl.BlockSpec(b2.shape, lambda i: (0, 0)),
            pl.BlockSpec(w3.shape, lambda i: (0, 0)),
            pl.BlockSpec(b3.shape, lambda i: (0, 0)),
        ],
        out_specs=pl.BlockSpec((OUT_ROWS, TB), lambda i: (0, i)),  # lane-dense
        compiler_params=pltpu.CompilerParams(
            dimension_semantics=("parallel",),          # megacore sharding on v7x
        ),
        cost_estimate=pl.CostEstimate(
            flops=flops, transcendentals=0, bytes_accessed=bytes_accessed),
    )(s, w1, b1, w2, b2, w3, b3)

    # Row 0 holds the values, lane-major over the (padded) batch.
    return out[0, :B].reshape(B, 1)


def init_critic_params(key, state_size, hidden1=HIDDEN1, hidden2=HIDDEN2,
                       hidden1_pad=HIDDEN1_PAD, hidden2_pad=HIDDEN2_PAD,
                       value_pad=VALUE_PAD):
    """PyTorch nn.Linear default init (U[-1/sqrt(fan_in), +]) at logical sizes,
    then zero-padded to MXU/lane-aligned sizes (bit-identical results)."""
    ks = jax.random.split(key, 6)

    def linear(kw, kb, fan_in, fan_out, fan_in_pad, fan_out_pad):
        bound = 1.0 / jnp.sqrt(float(fan_in))
        # stored as (in, out): transposed relative to torch's (out, in)
        w = jax.random.uniform(kw, (fan_in, fan_out), jnp.float32, -bound, bound)
        b = jax.random.uniform(kb, (1, fan_out), jnp.float32, -bound, bound)
        w = jnp.pad(w, ((0, fan_in_pad - fan_in), (0, fan_out_pad - fan_out)))
        b = jnp.pad(b, ((0, 0), (0, fan_out_pad - fan_out)))
        return w, b

    w1, b1 = linear(ks[0], ks[1], state_size, hidden1, state_size, hidden1_pad)
    w2, b2 = linear(ks[2], ks[3], hidden1, hidden2, hidden1_pad, hidden2_pad)
    w3, b3 = linear(ks[4], ks[5], hidden2, 1, hidden2_pad, value_pad)
    return {"w1": w1, "b1": b1, "w2": w2, "b2": b2, "w3": w3, "b3": b3,
            "hidden1": hidden1, "hidden2": hidden2}


def critic_reference(s, p):
    """Pure-JAX reference at the *logical* (unpadded) sizes, matching PyTorch."""
    h1d, h2d = p["hidden1"], p["hidden2"]
    w1, b1 = p["w1"][:, :h1d], p["b1"][:, :h1d]
    w2, b2 = p["w2"][:h1d, :h2d], p["b2"][:, :h2d]
    w3, b3 = p["w3"][:h2d, :1], p["b3"][:, :1]
    h1 = jnp.maximum(s @ w1 + b1, 0.0)
    h2 = jnp.maximum(h1 @ w2 + b2, 0.0)
    return h2 @ w3 + b3


if __name__ == "__main__":
    key = jax.random.PRNGKey(0)
    k_params, k_s1, k_s2 = jax.random.split(key, 3)

    state_size = 32
    params = init_critic_params(k_params, state_size)

    # Small batch: single grid step (typical PPO per-step critic call).
    s_small = jax.random.normal(k_s1, (10, state_size), jnp.float32)
    out_small = jax.block_until_ready(critic_forward(s_small, params))
    ref_small = critic_reference(s_small, params)
    assert out_small.shape == (10, 1), out_small.shape
    assert jnp.allclose(out_small, ref_small, atol=1e-4, rtol=1e-4)

    # Larger batch: exercises the multi-step grid, batch padding, and the
    # lane-dense transposed output path.
    s_big = jax.random.normal(k_s2, (300, state_size), jnp.float32)
    out_big = jax.block_until_ready(critic_forward(s_big, params))
    ref_big = critic_reference(s_big, params)
    assert out_big.shape == (300, 1), out_big.shape
    assert jnp.allclose(out_big, ref_big, atol=1e-4, rtol=1e-4)

    print("KERNEL_OK")
</pallas_src>

<mosaic_0001>
module attributes {stable_mosaic.version = 11 : i64} {
  func.func @critic_kernel(%arg0: i32, %arg1: memref<128x32xf32, #tpu.memory_space<vmem>>, %arg2: memref<32x512xf32, #tpu.memory_space<vmem>>, %arg3: memref<1x512xf32, #tpu.memory_space<vmem>>, %arg4: memref<512x512xf32, #tpu.memory_space<vmem>>, %arg5: memref<1x512xf32, #tpu.memory_space<vmem>>, %arg6: memref<512x128xf32, #tpu.memory_space<vmem>>, %arg7: memref<1x128xf32, #tpu.memory_space<vmem>>, %arg8: memref<8x128xf32, #tpu.memory_space<vmem>>) attributes {dimension_semantics = [#tpu.dimension_semantics<parallel>], iteration_bounds = array<i64: 1>, scalar_prefetch = 0 : i64, scratch_operands = 0 : i64, tpu.core_type = #tpu.core_type<tc>, window_params = [{transform_indices = @transform_0, window_bounds = array<i64: 128, 32>}, {pipeline_mode = #tpu.pipeline_mode<synchronous>, transform_indices = @transform_1, window_bounds = array<i64: 32, 512>}, {pipeline_mode = #tpu.pipeline_mode<synchronous>, transform_indices = @transform_2, window_bounds = array<i64: 1, 512>}, {pipeline_mode = #tpu.pipeline_mode<synchronous>, transform_indices = @transform_3, window_bounds = array<i64: 512, 512>}, {pipeline_mode = #tpu.pipeline_mode<synchronous>, transform_indices = @transform_4, window_bounds = array<i64: 1, 512>}, {pipeline_mode = #tpu.pipeline_mode<synchronous>, transform_indices = @transform_5, window_bounds = array<i64: 512, 128>}, {pipeline_mode = #tpu.pipeline_mode<synchronous>, transform_indices = @transform_6, window_bounds = array<i64: 1, 128>}, {transform_indices = @transform_7, window_bounds = array<i64: 8, 128>}]} {
    %c0 = arith.constant 0 : index
    %c0_0 = arith.constant 0 : index
    %0 = vector.load %arg1[%c0, %c0_0] : memref<128x32xf32, #tpu.memory_space<vmem>>, vector<128x32xf32>
    %c0_1 = arith.constant 0 : index
    %c0_2 = arith.constant 0 : index
    %1 = vector.load %arg2[%c0_1, %c0_2] : memref<32x512xf32, #tpu.memory_space<vmem>>, vector<32x512xf32>
    %cst = arith.constant dense<0.000000e+00> : vector<128x512xf32>
    %2 = tpu.matmul %0, %1, %cst {dimension_numbers = #tpu.dot_dimension_numbers<[1], [0], [0], [1], [0, 0, 1, 1], [], []>} : vector<128x32xf32>, vector<32x512xf32>, vector<128x512xf32> -> vector<128x512xf32>
    %c0_3 = arith.constant 0 : index
    %c0_4 = arith.constant 0 : index
    %3 = vector.load %arg3[%c0_3, %c0_4] : memref<1x512xf32, #tpu.memory_space<vmem>>, vector<1x512xf32>
    %4 = vector.broadcast %3 : vector<1x512xf32> to vector<128x512xf32>
    %5 = arith.addf %2, %4 : vector<128x512xf32>
    %cst_5 = arith.constant 0.000000e+00 : f32
    %6 = vector.broadcast %cst_5 : f32 to vector<128x512xf32>
    %7 = arith.maximumf %5, %6 : vector<128x512xf32>
    %c0_6 = arith.constant 0 : index
    %c0_7 = arith.constant 0 : index
    %8 = vector.load %arg4[%c0_6, %c0_7] : memref<512x512xf32, #tpu.memory_space<vmem>>, vector<512x512xf32>
    %cst_8 = arith.constant dense<0.000000e+00> : vector<128x512xf32>
    %9 = tpu.matmul %7, %8, %cst_8 {dimension_numbers = #tpu.dot_dimension_numbers<[1], [0], [0], [1], [0, 0, 1, 1], [], []>} : vector<128x512xf32>, vector<512x512xf32>, vector<128x512xf32> -> vector<128x512xf32>
    %c0_9 = arith.constant 0 : index
    %c0_10 = arith.constant 0 : index
    %10 = vector.load %arg5[%c0_9, %c0_10] : memref<1x512xf32, #tpu.memory_space<vmem>>, vector<1x512xf32>
    %11 = vector.broadcast %10 : vector<1x512xf32> to vector<128x512xf32>
    %12 = arith.addf %9, %11 : vector<128x512xf32>
    %cst_11 = arith.constant 0.000000e+00 : f32
    %13 = vector.broadcast %cst_11 : f32 to vector<128x512xf32>
    %14 = arith.maximumf %12, %13 : vector<128x512xf32>
    %c0_12 = arith.constant 0 : index
    %c0_13 = arith.constant 0 : index
    %15 = vector.load %arg6[%c0_12, %c0_13] : memref<512x128xf32, #tpu.memory_space<vmem>>, vector<512x128xf32>
    %cst_14 = arith.constant dense<0.000000e+00> : vector<128x128xf32>
    %16 = tpu.matmul %14, %15, %cst_14 {dimension_numbers = #tpu.dot_dimension_numbers<[1], [0], [0], [1], [0, 0, 1, 1], [], []>} : vector<128x512xf32>, vector<512x128xf32>, vector<128x128xf32> -> vector<128x128xf32>
    %c0_15 = arith.constant 0 : index
    %c0_16 = arith.constant 0 : index
    %17 = vector.load %arg7[%c0_15, %c0_16] : memref<1x128xf32, #tpu.memory_space<vmem>>, vector<1x128xf32>
    %18 = vector.broadcast %17 : vector<1x128xf32> to vector<128x128xf32>
    %19 = arith.addf %16, %18 : vector<128x128xf32>
    %20 = tpu.transpose %19, [1, 0] : vector<128x128xf32> -> vector<128x128xf32>
    %21 = vector.extract_strided_slice %20 {offsets = [0, 0], sizes = [8, 128], strides = [1, 1]} : vector<128x128xf32> to vector<8x128xf32>
    %c0_17 = arith.constant 0 : index
    %c0_18 = arith.constant 0 : index
    %22 = vector.load %arg8[%c0_17, %c0_18] : memref<8x128xf32, #tpu.memory_space<vmem>>, vector<8x128xf32>
    tpu.vector_store %arg8[%c0_17, %c0_18], %21 {strides = array<i32>} : memref<8x128xf32, #tpu.memory_space<vmem>>, vector<8x128xf32>,
    return
  }
  func.func @transform_0(%arg0: i32) -> (i32, i32) {
    %c0_i32 = arith.constant 0 : i32
    %c0_i32_0 = arith.constant 0 : i32
    return %arg0, %c0_i32 : i32, i32
  }
  func.func @transform_1(%arg0: i32) -> (i32, i32) {
    %c0_i32 = arith.constant 0 : i32
    %c0_i32_0 = arith.constant 0 : i32
    %c0_i32_1 = arith.constant 0 : i32
    return %c0_i32, %c0_i32_0 : i32, i32
  }
  func.func @transform_2(%arg0: i32) -> (i32, i32) {
    %c0_i32 = arith.constant 0 : i32
    %c0_i32_0 = arith.constant 0 : i32
    %c0_i32_1 = arith.constant 0 : i32
    return %c0_i32, %c0_i32_0 : i32, i32
  }
  func.func @transform_3(%arg0: i32) -> (i32, i32) {
    %c0_i32 = arith.constant 0 : i32
    %c0_i32_0 = arith.constant 0 : i32
    %c0_i32_1 = arith.constant 0 : i32
    return %c0_i32, %c0_i32_0 : i32, i32
  }
  func.func @transform_4(%arg0: i32) -> (i32, i32) {
    %c0_i32 = arith.constant 0 : i32
    %c0_i32_0 = arith.constant 0 : i32
    %c0_i32_1 = arith.constant 0 : i32
    return %c0_i32, %c0_i32_0 : i32, i32
  }
  func.func @transform_5(%arg0: i32) -> (i32, i32) {
    %c0_i32 = arith.constant 0 : i32
    %c0_i32_0 = arith.constant 0 : i32
    %c0_i32_1 = arith.constant 0 : i32
    return %c0_i32, %c0_i32_0 : i32, i32
  }
  func.func @transform_6(%arg0: i32) -> (i32, i32) {
    %c0_i32 = arith.constant 0 : i32
    %c0_i32_0 = arith.constant 0 : i32
    %c0_i32_1 = arith.constant 0 : i32
    return %c0_i32, %c0_i32_0 : i32, i32
  }
  func.func @transform_7(%arg0: i32) -> (i32, i32) {
    %c0_i32 = arith.constant 0 : i32
    %c0_i32_0 = arith.constant 0 : i32
    return %c0_i32, %arg0 : i32, i32
  }
}

</mosaic_0001>

<bundles_post_ra>
// kernel: tpu_custom_call.1
= control target key start
LH: loop header
LB: loop body
LE: loop exit
PB: predicated region body
PF: predicated region fallthrough
CT: control target
= control target key end

     0   :  { %12 = vsyncpa [#allocation3], 0  ;;  %s3220_s0 = inlined_call_operand.vmem [shape: f32[128,32], index: 0, kind: input, shape index: {}]   ;;  %s3221_s1 = inlined_call_operand.vmem [shape: f32[32,512], index: 1, kind: input, shape index: {}]   ;;  %s3222_s2 = inlined_call_operand.vmem [shape: f32[1,512], index: 2, kind: input, shape index: {}]   ;;  %s3223_s3 = inlined_call_operand.hbm [shape: f32[512,512], index: 3, kind: input, shape index: {}]   ;;  %s3224_s4 = inlined_call_operand.vmem [shape: f32[1,512], index: 4, kind: input, shape index: {}]   ;;  %s3225_s5 = inlined_call_operand.hbm [shape: f32[512,128], index: 5, kind: input, shape index: {}]   ;;  %s3226_s6 = inlined_call_operand.vmem [shape: f32[1,128], index: 6, kind: input, shape index: {}]   ;;  %s3227_s7 = inlined_call_operand.hbm [shape: f32[8,128], index: 7, kind: output, shape index: {}]  }
   0x1   :  { %13 = vsyncpa [#allocation6], 0 }
   0x2   :  { %14 = vsyncpa [#allocation4], 0  ;;  %s2677_s24 = smov [#allocation2]   ;;  %s2605_s28 = scalar_lea.hbm %s3223_s3, 32768 }
   0x3   :  { %s26_s25 = sshll.u32 %s2677_s24, 4  ;;  %p2606_p0 = scmp.ne.s32.totalorder %s3223_s3, %s2605_s28  ;;  %s27_s25 = int_to_ptr.vmem [resolvable:$true] %s26_s25 }
   0x4   :  { %p2609_p1 = scmp.lt.u32.totalorder %s2605_s28, %s3223_s3 }
   0x6   :  { %p2611_p2 = pnand %p2609_p1, %p2606_p0 }
   0x8   :  { %2614 = shalt.err (!%p2611_p2)
}
   0x9   :  { %s2615_s10 = scalar_lea.vmem %s27_s25, 32768  ;;  %p2620_p4 = scmp.lt.s32.totalorder %s27_s25, %s27_s25 }
   0xa   :  { %p2616_p3 = scmp.ne.s32.totalorder %s27_s25, %s2615_s10  ;;  %p2621_p5 = scmp.lt.s32.totalorder %s2615_s10, %s2615_s10 }
   0xc   :  { %p2622_p6 = por %p2621_p5, %p2620_p4 }
   0xe   :  { %p2623_p7 = pnand %p2622_p6, %p2616_p3 }
  0x10   :  { %2626 = shalt.err (!%p2623_p7)
}
  0x11   :  { %s2678_s11 = smov 512   ;;  %s2679_s12 = smov 32  }
  0x12   :  { %32 = dma.hbm_to_vmem [thread:$0]  %s3223_s3, 32768, %s27_s25, [#allocation3], %s2678_s11, %s2678_s11, %s2679_s12  }
  0x13   :  { %s2680_s15 = smov [#allocation5]   ;;  %s2627_s19 = scalar_lea.hbm %s3225_s5, 8192 }
  0x14   :  { %s40_s16 = sshll.u32 %s2680_s15, 4  ;;  %p2628_p8 = scmp.ne.s32.totalorder %s3225_s5, %s2627_s19  ;;  %s41_s16 = int_to_ptr.vmem [resolvable:$true] %s40_s16 }
  0x15   :  { %p2631_p9 = scmp.lt.u32.totalorder %s2627_s19, %s3225_s5 }
  0x17   :  { %p2633_p10 = pnand %p2631_p9, %p2628_p8 }
  0x19   :  { %2636 = shalt.err (!%p2633_p10)
}
  0x1a   :  { %s2637_s24 = scalar_lea.vmem %s41_s16, 8192  ;;  %p2642_p12 = scmp.lt.s32.totalorder %s41_s16, %s41_s16 }
  0x1b   :  { %p2638_p11 = scmp.ne.s32.totalorder %s41_s16, %s2637_s24  ;;  %p2643_p13 = scmp.lt.s32.totalorder %s2637_s24, %s2637_s24 }
  0x1d   :  { %p2644_p0 = por %p2643_p13, %p2642_p12 }
  0x1f   :  { %p2645_p1 = pnand %p2644_p0, %p2638_p11 }
  0x21   :  { %2648 = shalt.err (!%p2645_p1)
}
  0x22   :  { %s2681_s3 = smov 128   ;;  %s2682_s25 = smov 8  }
  0x23   :  { %46 = dma.hbm_to_vmem [thread:$0]  %s3225_s5, 8192, %s41_s16, [#allocation6], %s2681_s3, %s2681_s3, %s2682_s25  }
  0x24   :  { %2671 = dma.done.wait [#allocation3], 32768  }
  0x25   :  { %2672 = vsyncadd [#allocation3], 4294934528 }
  0x26   :  { %2673 = dma.done.wait [#allocation6], 8192  }
  0x27   :  { %2674 = vsyncadd [#allocation6], 4294959104  ;;  %v2683_v0 = vmov 0.0   ;;  %v72_v1 = vld [vmem:[%s3221_s1 + $0x8] sm:$0xff]  ;;  %v71_v3 = vld [vmem:[%s3221_s1] sm:$0xff]  ;;  %vm109_vm0 = vcmask 261120  }
  0x28   :  { %222 = vmatprep.mubr.f32.mxu0 %v2683_v0  ;;  %383 = vmatprep.mubr.f32.mxu1 %v2683_v0  ;;  %v76_v2 = vld [vmem:[%s3221_s1 + $0x28] sm:$0xff]  ;;  %v75_v5 = vld [vmem:[%s3221_s1 + $0x20] sm:$0xff]  ;;  %v74_v13 = vld [vmem:[%s3221_s1 + $0x18] sm:$0xff] }
  0x29   :  { %v2133_v4 = vpack.c.bf16 %v76_v2, %v72_v1  ;;  %v80_v6 = vld [vmem:[%s3221_s1 + $0x48] sm:$0xff]  ;;  %v2135_v8 = vpack.c.bf16 %v75_v5, %v71_v3  ;;  %v79_v10 = vld [vmem:[%s3221_s1 + $0x40] sm:$0xff]  ;;  %v78_v14 = vld [vmem:[%s3221_s1 + $0x38] sm:$0xff] }
  0x2a   :  { %v84_v7 = vld [vmem:[%s3221_s1 + $0x68] sm:$0xff]  ;;  %v83_v11 = vld [vmem:[%s3221_s1 + $0x60] sm:$0xff]  ;;  %v2141_v16 = vpack.c.bf16 %v78_v14, %v74_v13  ;;  %v73_v17 = vld [vmem:[%s3221_s1 + $0x10] sm:$0xff] }
  0x2b   :  { %v2137_v9 = vpack.c.bf16 %v84_v7, %v80_v6  ;;  %2134 = vmatprep.subr.bf16.mxu0 %v2133_v4  ;;  %v2139_v12 = vpack.c.bf16 %v83_v11, %v79_v10  ;;  %v55_v15 = vld [vmem:[%s3220_s0] sm:$0xff]  ;;  %v77_v18 = vld [vmem:[%s3221_s1 + $0x30] sm:$0xff]  ;;  %v82_v20 = vld [vmem:[%s3221_s1 + $0x58] sm:$0xff] }
  0x2c   :  { %2136 = vmatpush1.bf16.msra.mxu0 %v2135_v8  ;;  %v2143_v19 = vpack.c.bf16 %v77_v18, %v73_v17  ;;  %v86_v21 = vld [vmem:[%s3221_s1 + $0x78] sm:$0xff]  ;;  %v2799_v22 = vld [vmem:[%s3220_s0 + $0x8] sm:$0xff]  ;;  %2142 = vmatprep.subr.bf16.mxu1 %v2141_v16  ;;  %v81_v24 = vld [vmem:[%s3221_s1 + $0x50] sm:$0xff] }
  0x2d   :  { %2138 = vmatprep.subr.bf16.mxu0 %v2137_v9  ;;  %v2145_v23 = vpack.c.bf16 %v86_v21, %v82_v20  ;;  %v85_v25 = vld [vmem:[%s3221_s1 + $0x70] sm:$0xff]  ;;  %v545_v26 = vld [vmem:[#allocation2 + $0x8] sm:$0xff]  ;;  %v544_v29 = vld [vmem:[#allocation2] sm:$0xff] }
  0x2e   :  { %2144 = vmatpush1.bf16.msra.mxu1 %v2143_v19  ;;  %v2147_v27 = vpack.c.bf16 %v85_v25, %v81_v24  ;;  %v549_v28 = vld [vmem:[#allocation2 + $0x28] sm:$0xff]  ;;  %v548_v30 = vld [vmem:[#allocation2 + $0x20] sm:$0xff]  ;;  %v547_v33 = vld [vmem:[#allocation2 + $0x18] sm:$0xff] }
  0x2f   :  { %2146 = vmatprep.subr.bf16.mxu1 %v2145_v23  ;;  %v2149_v31 = vpack.c.bf16 %v549_v28, %v545_v26  ;;  %v2151_v32 = vpack.c.bf16 %v548_v30, %v544_v29  ;;  %v551_v34 = vld [vmem:[#allocation2 + $0x38] sm:$0xff]  ;;  %v546_v35 = vld [vmem:[#allocation2 + $0x10] sm:$0xff]  ;;  %v553_v38 = vld [vmem:[#allocation2 + $0x48] sm:$0xff] }
  0x30   :  { %2140 = vmatpush1.bf16.msra.mxu0 %v2139_v12  ;;  %v2277_v36 = vpack.c.bf16 %v551_v34, %v547_v33  ;;  %v550_v37 = vld [vmem:[#allocation2 + $0x30] sm:$0xff]  ;;  %v557_v39 = vld [vmem:[#allocation2 + $0x68] sm:$0xff]  ;;  %v552_v41 = vld [vmem:[#allocation2 + $0x40] sm:$0xff] }
  0x31   :  { %2150 = vmatprep.subr.bf16.mxu0 %v2149_v31  ;;  %v2153_v40 = vpack.c.bf16 %v557_v39, %v553_v38  ;;  %v556_v42 = vld [vmem:[#allocation2 + $0x60] sm:$0xff]  ;;  %v555_v43 = vld [vmem:[#allocation2 + $0x58] sm:$0xff]  ;;  %v57_v45 = vld [vmem:[%s3220_s0 + $0x10] sm:$0xff]  ;;  %v2279_v46 = vpack.c.bf16 %v550_v37, %v546_v35 }
  0x32   :  { %2148 = vmatpush1.bf16.msra.mxu1 %v2147_v27  ;;  %v559_v44 = vld [vmem:[#allocation2 + $0x78] sm:$0xff]  ;;  %v561_v47 = vld [vmem:[#allocation2 + $0x88] sm:$0xff]  ;;  %v2155_v49 = vpack.c.bf16 %v556_v42, %v552_v41  ;;  %v554_v51 = vld [vmem:[#allocation2 + $0x50] sm:$0xff] }
  0x33   :  { %1940 = vmatmul.mubr.msk.f32.vlgmr.msra.gmra.mrb[0].mxu0 %vm109_vm0, %v55_v15  ;;  %v565_v48 = vld [vmem:[#allocation2 + $0xa8] sm:$0xff]  ;;  %2278 = vmatprep.subr.bf16.mxu1 %v2277_v36  ;;  %v2281_v50 = vpack.c.bf16 %v559_v44, %v555_v43  ;;  %v558_v52 = vld [vmem:[#allocation2 + $0x70] sm:$0xff]  ;;  %v560_v53 = vld [vmem:[#allocation2 + $0x80] sm:$0xff] }
  0x34   :  { %228 = vmatprep.mubr.f32.mxu0 %v2683_v0  ;;  %2152 = vmatpush1.bf16.msra.mxu0 %v2151_v32  ;;  %v2157_v54 = vpack.c.bf16 %v565_v48, %v561_v47  ;;  %v564_v55 = vld [vmem:[#allocation2 + $0xa0] sm:$0xff]  ;;  %v563_v56 = vld [vmem:[#allocation2 + $0x98] sm:$0xff]  ;;  %v569_v58 = vld [vmem:[#allocation2 + $0xc8] sm:$0xff]  ;;  %v2283_v61 = vpack.c.bf16 %v558_v52, %v554_v51 }
  0x35   :  { %2154 = vmatprep.subr.bf16.mxu0 %v2153_v40  ;;  %1956 = vmatmul.mubr.msk.f32.vlgmr.msra.gmra.mrb[0].mxu1 %vm109_vm0, %v55_v15  ;;  %v567_v57 = vld [vmem:[#allocation2 + $0xb8] sm:$0xff]  ;;  %v573_v59 = vld [vmem:[#allocation2 + $0xe8] sm:$0xff]  ;;  %v2159_v62 = vpack.c.bf16 %v564_v55, %v560_v53  ;;  %v562_v1 = vld [vmem:[#allocation2 + $0x90] sm:$0xff] }
  0x36   :  { %389 = vmatprep.mubr.f32.mxu1 %v2683_v0  ;;  %v58_v60 = vld [vmem:[%s3220_s0 + $0x18] sm:$0xff]  ;;  %2280 = vmatpush1.bf16.msra.mxu1 %v2279_v46  ;;  %v2285_v63 = vpack.c.bf16 %v567_v57, %v563_v56  ;;  %v566_v2 = vld [vmem:[#allocation2 + $0xb0] sm:$0xff]  ;;  %v568_v3 = vld [vmem:[#allocation2 + $0xc0] sm:$0xff]  ;;  %v2161_v4 = vpack.c.bf16 %v573_v59, %v569_v58 }
  0x37   :  { %1941 = vmatmul.mubr.msk.f32.gmra.mrb[2].mxu0 %vm109_vm0, %v2799_v22  ;;  %2282 = vmatprep.subr.bf16.mxu1 %v2281_v50  ;;  %v572_v5 = vld [vmem:[#allocation2 + $0xe0] sm:$0xff]  ;;  %v571_v6 = vld [vmem:[#allocation2 + $0xd8] sm:$0xff]  ;;  %v577_v8 = vld [vmem:[#allocation2 + $0x108] sm:$0xff]  ;;  %v2287_v11 = vpack.c.bf16 %v566_v2, %v562_v1 }
  0x38   :  { %234 = vmatprep.mubr.f32.mxu0 %v2683_v0  ;;  %2156 = vmatpush1.bf16.msra.mxu0 %v2155_v49  ;;  %v575_v7 = vld [vmem:[#allocation2 + $0xf8] sm:$0xff]  ;;  %v581_v9 = vld [vmem:[#allocation2 + $0x128] sm:$0xff]  ;;  %v59_v10 = vld [vmem:[%s3220_s0 + $0x20] sm:$0xff]  ;;  %v2163_v12 = vpack.c.bf16 %v572_v5, %v568_v3 }
  0x39   :  { %1957 = vmatmul.mubr.msk.f32.gmra.mrb[2].mxu1 %vm109_vm0, %v2799_v22  ;;  %2158 = vmatprep.subr.bf16.mxu0 %v2157_v54  ;;  %v2289_v13 = vpack.c.bf16 %v575_v7, %v571_v6  ;;  %v570_v14 = vld [vmem:[#allocation2 + $0xd0] sm:$0xff]  ;;  %v576_v16 = vld [vmem:[#allocation2 + $0x100] sm:$0xff]  ;;  %v2165_v17 = vpack.c.bf16 %v581_v9, %v577_v8  ;;  %v579_v19 = vld [vmem:[#allocation2 + $0x118] sm:$0xff] }
  0x3a   :  { %395 = vmatprep.mubr.f32.mxu1 %v2683_v0  ;;  %2284 = vmatpush1.bf16.msra.mxu1 %v2283_v61  ;;  %v574_v15 = vld [vmem:[#allocation2 + $0xf0] sm:$0xff]  ;;  %v580_v18 = vld [vmem:[#allocation2 + $0x120] sm:$0xff]  ;;  %v583_v20 = vld [vmem:[#allocation2 + $0x138] sm:$0xff] }
  0x3b   :  { %1942 = vmatmul.mubr.msk.f32.gmra.mrb[4].mxu0 %vm109_vm0, %v57_v45  ;;  %2286 = vmatprep.subr.bf16.mxu1 %v2285_v63  ;;  %v585_v21 = vld [vmem:[#allocation2 + $0x148] sm:$0xff]  ;;  %v2291_v24 = vpack.c.bf16 %v574_v15, %v570_v14  ;;  %v2167_v25 = vpack.c.bf16 %v580_v18, %v576_v16  ;;  %v2293_v26 = vpack.c.bf16 %v583_v20, %v579_v19  ;;  %v578_v27 = vld [vmem:[#allocation2 + $0x110] sm:$0xff]  ;;  %v584_v29 = vld [vmem:[#allocation2 + $0x140] sm:$0xff] }
  0x3c   :  { %240 = vmatprep.mubr.f32.mxu0 %v2683_v0  ;;  %2160 = vmatpush1.bf16.msra.mxu0 %v2159_v62  ;;  %v589_v22 = vld [vmem:[#allocation2 + $0x168] sm:$0xff]  ;;  %v582_v28 = vld [vmem:[#allocation2 + $0x130] sm:$0xff]  ;;  %v588_v31 = vld [vmem:[#allocation2 + $0x160] sm:$0xff] }
  0x3d   :  { %1958 = vmatmul.mubr.msk.f32.gmra.mrb[4].mxu1 %vm109_vm0, %v57_v45  ;;  %2162 = vmatprep.subr.bf16.mxu0 %v2161_v4  ;;  %v60_v23 = vld [vmem:[%s3220_s0 + $0x28] sm:$0xff]  ;;  %v2169_v30 = vpack.c.bf16 %v589_v22, %v585_v21  ;;  %v587_v32 = vld [vmem:[#allocation2 + $0x158] sm:$0xff]  ;;  %v61_v36 = vld [vmem:[%s3220_s0 + $0x30] sm:$0xff]  ;;  %v2295_v37 = vpack.c.bf16 %v582_v28, %v578_v27  ;;  %v2171_v38 = vpack.c.bf16 %v588_v31, %v584_v29 }
  0x3e   :  { %401 = vmatprep.mubr.f32.mxu1 %v2683_v0  ;;  %2288 = vmatpush1.bf16.msra.mxu1 %v2287_v11  ;;  %v591_v33 = vld [vmem:[#allocation2 + $0x178] sm:$0xff]  ;;  %v593_v34 = vld [vmem:[#allocation2 + $0x188] sm:$0xff]  ;;  %v586_v40 = vld [vmem:[#allocation2 + $0x150] sm:$0xff] }
  0x3f   :  { %1943 = vmatmul.mubr.msk.f32.gmra.mrb[6].mxu0 %vm109_vm0, %v58_v60  ;;  %2290 = vmatprep.subr.bf16.mxu1 %v2289_v13  ;;  %v597_v35 = vld [vmem:[#allocation2 + $0x1a8] sm:$0xff]  ;;  %v2297_v39 = vpack.c.bf16 %v591_v33, %v587_v32  ;;  %v590_v41 = vld [vmem:[#allocation2 + $0x170] sm:$0xff]  ;;  %v592_v42 = vld [vmem:[#allocation2 + $0x180] sm:$0xff] }
  0x40   :  { %246 = vmatprep.mubr.f32.mxu0 %v2683_v0  ;;  %2164 = vmatpush1.bf16.msra.mxu0 %v2163_v12  ;;  %v2173_v43 = vpack.c.bf16 %v597_v35, %v593_v34  ;;  %v596_v44 = vld [vmem:[#allocation2 + $0x1a0] sm:$0xff]  ;;  %v595_v45 = vld [vmem:[#allocation2 + $0x198] sm:$0xff]  ;;  %v601_v47 = vld [vmem:[#allocation2 + $0x1c8] sm:$0xff]  ;;  %v2299_v50 = vpack.c.bf16 %v590_v41, %v586_v40 }
  0x41   :  { %1959 = vmatmul.mubr.msk.f32.gmra.mrb[6].mxu1 %vm109_vm0, %v58_v60  ;;  %2166 = vmatprep.subr.bf16.mxu0 %v2165_v17  ;;  %v599_v46 = vld [vmem:[#allocation2 + $0x1b8] sm:$0xff]  ;;  %v605_v48 = vld [vmem:[#allocation2 + $0x1e8] sm:$0xff]  ;;  %v2175_v51 = vpack.c.bf16 %v596_v44, %v592_v42  ;;  %v594_v53 = vld [vmem:[#allocation2 + $0x190] sm:$0xff] }
  0x42   :  { %407 = vmatprep.mubr.f32.mxu1 %v2683_v0  ;;  %2292 = vmatpush1.bf16.msra.mxu1 %v2291_v24  ;;  %v62_v49 = vld [vmem:[%s3220_s0 + $0x38] sm:$0xff]  ;;  %v2301_v52 = vpack.c.bf16 %v599_v46, %v595_v45  ;;  %v598_v54 = vld [vmem:[#allocation2 + $0x1b0] sm:$0xff]  ;;  %v600_v55 = vld [vmem:[#allocation2 + $0x1c0] sm:$0xff]  ;;  %v2177_v56 = vpack.c.bf16 %v605_v48, %v601_v47 }
  0x43   :  { %1944 = vmatmul.mubr.msk.f32.gmra.mrb[8].mxu0 %vm109_vm0, %v59_v10  ;;  %2294 = vmatprep.subr.bf16.mxu1 %v2293_v26  ;;  %v604_v57 = vld [vmem:[#allocation2 + $0x1e0] sm:$0xff]  ;;  %v603_v58 = vld [vmem:[#allocation2 + $0x1d8] sm:$0xff]  ;;  %v609_v60 = vld [vmem:[#allocation2 + $0x208] sm:$0xff]  ;;  %v2303_v63 = vpack.c.bf16 %v598_v54, %v594_v53 }
  0x44   :  { %252 = vmatprep.mubr.f32.mxu0 %v2683_v0  ;;  %2168 = vmatpush1.bf16.msra.mxu0 %v2167_v25  ;;  %v607_v59 = vld [vmem:[#allocation2 + $0x1f8] sm:$0xff]  ;;  %v613_v61 = vld [vmem:[#allocation2 + $0x228] sm:$0xff]  ;;  %v63_v62 = vld [vmem:[%s3220_s0 + $0x40] sm:$0xff]  ;;  %v2179_v1 = vpack.c.bf16 %v604_v57, %v600_v55 }
  0x45   :  { %1960 = vmatmul.mubr.msk.f32.gmra.mrb[8].mxu1 %vm109_vm0, %v59_v10  ;;  %2170 = vmatprep.subr.bf16.mxu0 %v2169_v30  ;;  %v2305_v2 = vpack.c.bf16 %v607_v59, %v603_v58  ;;  %v602_v3 = vld [vmem:[#allocation2 + $0x1d0] sm:$0xff]  ;;  %v608_v5 = vld [vmem:[#allocation2 + $0x200] sm:$0xff]  ;;  %v2181_v6 = vpack.c.bf16 %v613_v61, %v609_v60  ;;  %v611_v8 = vld [vmem:[#allocation2 + $0x218] sm:$0xff] }
  0x46   :  { %413 = vmatprep.mubr.f32.mxu1 %v2683_v0  ;;  %2296 = vmatpush1.bf16.msra.mxu1 %v2295_v37  ;;  %v606_v4 = vld [vmem:[#allocation2 + $0x1f0] sm:$0xff]  ;;  %v612_v7 = vld [vmem:[#allocation2 + $0x220] sm:$0xff]  ;;  %v615_v9 = vld [vmem:[#allocation2 + $0x238] sm:$0xff] }
  0x47   :  { %1945 = vmatmul.mubr.msk.f32.gmra.mrb[10].mxu0 %vm109_vm0, %v60_v23  ;;  %2298 = vmatprep.subr.bf16.mxu1 %v2297_v39  ;;  %v617_v10 = vld [vmem:[#allocation2 + $0x248] sm:$0xff]  ;;  %v2307_v13 = vpack.c.bf16 %v606_v4, %v602_v3  ;;  %v2183_v14 = vpack.c.bf16 %v612_v7, %v608_v5  ;;  %v2309_v15 = vpack.c.bf16 %v615_v9, %v611_v8  ;;  %v610_v16 = vld [vmem:[#allocation2 + $0x210] sm:$0xff]  ;;  %v616_v18 = vld [vmem:[#allocation2 + $0x240] sm:$0xff] }
  0x48   :  { %258 = vmatprep.mubr.f32.mxu0 %v2683_v0  ;;  %2172 = vmatpush1.bf16.msra.mxu0 %v2171_v38  ;;  %v621_v11 = vld [vmem:[#allocation2 + $0x268] sm:$0xff]  ;;  %v614_v17 = vld [vmem:[#allocation2 + $0x230] sm:$0xff]  ;;  %v620_v20 = vld [vmem:[#allocation2 + $0x260] sm:$0xff] }
  0x49   :  { %1961 = vmatmul.mubr.msk.f32.gmra.mrb[10].mxu1 %vm109_vm0, %v60_v23  ;;  %2174 = vmatprep.subr.bf16.mxu0 %v2173_v43  ;;  %v64_v12 = vld [vmem:[%s3220_s0 + $0x48] sm:$0xff]  ;;  %v2185_v19 = vpack.c.bf16 %v621_v11, %v617_v10  ;;  %v619_v21 = vld [vmem:[#allocation2 + $0x258] sm:$0xff]  ;;  %v65_v25 = vld [vmem:[%s3220_s0 + $0x50] sm:$0xff]  ;;  %v2311_v26 = vpack.c.bf16 %v614_v17, %v610_v16  ;;  %v2187_v27 = vpack.c.bf16 %v620_v20, %v616_v18 }
  0x4a   :  { %419 = vmatprep.mubr.f32.mxu1 %v2683_v0  ;;  %2300 = vmatpush1.bf16.msra.mxu1 %v2299_v50  ;;  %v623_v22 = vld [vmem:[#allocation2 + $0x278] sm:$0xff]  ;;  %v625_v23 = vld [vmem:[#allocation2 + $0x288] sm:$0xff]  ;;  %v618_v29 = vld [vmem:[#allocation2 + $0x250] sm:$0xff] }
  0x4b   :  { %1946 = vmatmul.mubr.msk.f32.gmra.mrb[12].mxu0 %vm109_vm0, %v61_v36  ;;  %2302 = vmatprep.subr.bf16.mxu1 %v2301_v52  ;;  %v629_v24 = vld [vmem:[#allocation2 + $0x2a8] sm:$0xff]  ;;  %v2313_v28 = vpack.c.bf16 %v623_v22, %v619_v21  ;;  %v622_v30 = vld [vmem:[#allocation2 + $0x270] sm:$0xff]  ;;  %v624_v31 = vld [vmem:[#allocation2 + $0x280] sm:$0xff] }
  0x4c   :  { %264 = vmatprep.mubr.f32.mxu0 %v2683_v0  ;;  %2176 = vmatpush1.bf16.msra.mxu0 %v2175_v51  ;;  %v2189_v32 = vpack.c.bf16 %v629_v24, %v625_v23  ;;  %v628_v33 = vld [vmem:[#allocation2 + $0x2a0] sm:$0xff]  ;;  %v627_v34 = vld [vmem:[#allocation2 + $0x298] sm:$0xff]  ;;  %v637_v37 = vld [vmem:[#allocation2 + $0x2e8] sm:$0xff]  ;;  %v2315_v39 = vpack.c.bf16 %v622_v30, %v618_v29 }
  0x4d   :  { %1962 = vmatmul.mubr.msk.f32.gmra.mrb[12].mxu1 %vm109_vm0, %v61_v36  ;;  %2178 = vmatprep.subr.bf16.mxu0 %v2177_v56  ;;  %v631_v35 = vld [vmem:[#allocation2 + $0x2b8] sm:$0xff]  ;;  %v633_v36 = vld [vmem:[#allocation2 + $0x2c8] sm:$0xff]  ;;  %v2191_v40 = vpack.c.bf16 %v628_v33, %v624_v31  ;;  %v626_v42 = vld [vmem:[#allocation2 + $0x290] sm:$0xff] }
  0x4e   :  { %425 = vmatprep.mubr.f32.mxu1 %v2683_v0  ;;  %2304 = vmatpush1.bf16.msra.mxu1 %v2303_v63  ;;  %v66_v38 = vld [vmem:[%s3220_s0 + $0x58] sm:$0xff]  ;;  %v2317_v41 = vpack.c.bf16 %v631_v35, %v627_v34  ;;  %v630_v43 = vld [vmem:[#allocation2 + $0x2b0] sm:$0xff]  ;;  %v632_v44 = vld [vmem:[#allocation2 + $0x2c0] sm:$0xff]  ;;  %v2193_v45 = vpack.c.bf16 %v637_v37, %v633_v36 }
  0x4f   :  { %1947 = vmatmul.mubr.msk.f32.gmra.mrb[14].mxu0 %vm109_vm0, %v62_v49  ;;  %2306 = vmatprep.subr.bf16.mxu1 %v2305_v2  ;;  %v636_v46 = vld [vmem:[#allocation2 + $0x2e0] sm:$0xff]  ;;  %v635_v47 = vld [vmem:[#allocation2 + $0x2d8] sm:$0xff]  ;;  %v645_v50 = vld [vmem:[#allocation2 + $0x328] sm:$0xff]  ;;  %v2319_v52 = vpack.c.bf16 %v630_v43, %v626_v42 }
  0x50   :  { %270 = vmatprep.mubr.f32.mxu0 %v2683_v0  ;;  %2180 = vmatpush1.bf16.msra.mxu0 %v2179_v1  ;;  %v639_v48 = vld [vmem:[#allocation2 + $0x2f8] sm:$0xff]  ;;  %v67_v51 = vld [vmem:[%s3220_s0 + $0x60] sm:$0xff]  ;;  %v2195_v53 = vpack.c.bf16 %v636_v46, %v632_v44  ;;  %v634_v55 = vld [vmem:[#allocation2 + $0x2d0] sm:$0xff] }
  0x51   :  { %1963 = vmatmul.mubr.msk.f32.gmra.mrb[14].mxu1 %vm109_vm0, %v62_v49  ;;  %2182 = vmatprep.subr.bf16.mxu0 %v2181_v6  ;;  %v641_v49 = vld [vmem:[#allocation2 + $0x308] sm:$0xff]  ;;  %v2321_v54 = vpack.c.bf16 %v639_v48, %v635_v47  ;;  %v638_v56 = vld [vmem:[#allocation2 + $0x2f0] sm:$0xff]  ;;  %v640_v57 = vld [vmem:[#allocation2 + $0x300] sm:$0xff] }
  0x52   :  { %431 = vmatprep.mubr.f32.mxu1 %v2683_v0  ;;  %2308 = vmatpush1.bf16.msra.mxu1 %v2307_v13  ;;  %v2197_v58 = vpack.c.bf16 %v645_v50, %v641_v49  ;;  %v644_v59 = vld [vmem:[#allocation2 + $0x320] sm:$0xff]  ;;  %v643_v60 = vld [vmem:[#allocation2 + $0x318] sm:$0xff]  ;;  %v653_v63 = vld [vmem:[#allocation2 + $0x368] sm:$0xff]  ;;  %v2323_v2 = vpack.c.bf16 %v638_v56, %v634_v55  ;;  %v89_v49 = vlaneseq }
  0x53   :  { %1948 = vmatmul.mubr.msk.f32.gmra.mrb[16].mxu0 %vm109_vm0, %v63_v62  ;;  %2310 = vmatprep.subr.bf16.mxu1 %v2309_v15  ;;  %v647_v61 = vld [vmem:[#allocation2 + $0x338] sm:$0xff]  ;;  %v68_v1 = vld [vmem:[%s3220_s0 + $0x68] sm:$0xff]  ;;  %v2199_v3 = vpack.c.bf16 %v644_v59, %v640_v57  ;;  %v642_v5 = vld [vmem:[#allocation2 + $0x310] sm:$0xff] }
  0x54   :  { %276 = vmatprep.mubr.f32.mxu0 %v2683_v0  ;;  %2184 = vmatpush1.bf16.msra.mxu0 %v2183_v14  ;;  %v2325_v4 = vpack.c.bf16 %v647_v61, %v643_v60  ;;  %v646_v6 = vld [vmem:[#allocation2 + $0x330] sm:$0xff]  ;;  %v648_v7 = vld [vmem:[#allocation2 + $0x340] sm:$0xff]  ;;  %v651_v10 = vld [vmem:[#allocation2 + $0x358] sm:$0xff]  ;;  %v2913_v50 = vshrl.u32 %v89_v49, 7 }
  0x55   :  { %1964 = vmatmul.mubr.msk.f32.gmra.mrb[16].mxu1 %vm109_vm0, %v63_v62  ;;  %2186 = vmatprep.subr.bf16.mxu0 %v2185_v19  ;;  %v649_v62 = vld [vmem:[#allocation2 + $0x348] sm:$0xff]  ;;  %v652_v9 = vld [vmem:[#allocation2 + $0x360] sm:$0xff]  ;;  %v655_v11 = vld [vmem:[#allocation2 + $0x378] sm:$0xff]  ;;  %v2327_v15 = vpack.c.bf16 %v646_v6, %v642_v5 }
  0x56   :  { %437 = vmatprep.mubr.f32.mxu1 %v2683_v0  ;;  %2312 = vmatpush1.bf16.msra.mxu1 %v2311_v26  ;;  %v2201_v8 = vpack.c.bf16 %v653_v63, %v649_v62  ;;  %v661_v13 = vld [vmem:[#allocation2 + $0x3a8] sm:$0xff]  ;;  %v69_v14 = vld [vmem:[%s3220_s0 + $0x70] sm:$0xff]  ;;  %v2203_v16 = vpack.c.bf16 %v652_v9, %v648_v7  ;;  %v2329_v17 = vpack.c.bf16 %v655_v11, %v651_v10  ;;  %v656_v20 = vld [vmem:[#allocation2 + $0x380] sm:$0xff] }
  0x57   :  { %1949 = vmatmul.mubr.msk.f32.gmra.mrb[18].mxu0 %vm109_vm0, %v64_v12  ;;  %2314 = vmatprep.subr.bf16.mxu1 %v2313_v28  ;;  %v650_v18 = vld [vmem:[#allocation2 + $0x350] sm:$0xff]  ;;  %v660_v22 = vld [vmem:[#allocation2 + $0x3a0] sm:$0xff]  ;;  %v659_v23 = vld [vmem:[#allocation2 + $0x398] sm:$0xff] }
  0x58   :  { %282 = vmatprep.mubr.f32.mxu0 %v2683_v0  ;;  %2188 = vmatpush1.bf16.msra.mxu0 %v2187_v27  ;;  %v654_v19 = vld [vmem:[#allocation2 + $0x370] sm:$0xff]  ;;  %v663_v24 = vld [vmem:[#allocation2 + $0x3b8] sm:$0xff]  ;;  %v2207_v27 = vpack.c.bf16 %v660_v22, %v656_v20  ;;  %v669_v33 = vld [vmem:[#allocation2 + $0x3e8] sm:$0xff] }
  0x59   :  { %1965 = vmatmul.mubr.msk.f32.gmra.mrb[18].mxu1 %vm109_vm0, %v64_v12  ;;  %2190 = vmatprep.subr.bf16.mxu0 %v2189_v32  ;;  %v657_v12 = vld [vmem:[#allocation2 + $0x388] sm:$0xff]  ;;  %v2331_v26 = vpack.c.bf16 %v654_v19, %v650_v18  ;;  %v2333_v28 = vpack.c.bf16 %v663_v24, %v659_v23  ;;  %v658_v29 = vld [vmem:[#allocation2 + $0x390] sm:$0xff]  ;;  %v667_v34 = vld [vmem:[#allocation2 + $0x3d8] sm:$0xff] }
  0x5a   :  { %443 = vmatprep.mubr.f32.mxu1 %v2683_v0  ;;  %2316 = vmatpush1.bf16.msra.mxu1 %v2315_v39  ;;  %v2205_v21 = vpack.c.bf16 %v661_v13, %v657_v12  ;;  %v662_v30 = vld [vmem:[#allocation2 + $0x3b0] sm:$0xff]  ;;  %v665_v32 = vld [vmem:[#allocation2 + $0x3c8] sm:$0xff]  ;;  %v664_v36 = vld [vmem:[#allocation2 + $0x3c0] sm:$0xff] }
  0x5b   :  { %1950 = vmatmul.mubr.msk.f32.gmra.mrb[20].mxu0 %vm109_vm0, %v65_v25  ;;  %2318 = vmatprep.subr.bf16.mxu1 %v2317_v41  ;;  %v2335_v31 = vpack.c.bf16 %v662_v30, %v658_v29  ;;  %v2209_v35 = vpack.c.bf16 %v669_v33, %v665_v32  ;;  %v668_v37 = vld [vmem:[#allocation2 + $0x3e0] sm:$0xff]  ;;  %v666_v41 = vld [vmem:[#allocation2 + $0x3d0] sm:$0xff]  ;;  %v677_v44 = vld [vmem:[#allocation2 + $0x428] sm:$0xff] }
  0x5c   :  { %288 = vmatprep.mubr.f32.mxu0 %v2683_v0  ;;  %2192 = vmatpush1.bf16.msra.mxu0 %v2191_v40  ;;  %v2211_v39 = vpack.c.bf16 %v668_v37, %v664_v36  ;;  %v670_v42 = vld [vmem:[#allocation2 + $0x3f0] sm:$0xff]  ;;  %v679_v47 = vld [vmem:[#allocation2 + $0x438] sm:$0xff]  ;;  %v672_v57 = vld [vmem:[#allocation2 + $0x400] sm:$0xff] }
  0x5d   :  { %1966 = vmatmul.mubr.msk.f32.gmra.mrb[20].mxu1 %vm109_vm0, %v65_v25  ;;  %2194 = vmatprep.subr.bf16.mxu0 %v2193_v45  ;;  %v70_v25 = vld [vmem:[%s3220_s0 + $0x78] sm:$0xff]  ;;  %v2339_v43 = vpack.c.bf16 %v670_v42, %v666_v41  ;;  %v674_v61 = vld [vmem:[#allocation2 + $0x410] sm:$0xff]  ;;  %v681_v63 = vld [vmem:[#allocation2 + $0x448] sm:$0xff] }
  0x5e   :  { %449 = vmatprep.mubr.f32.mxu1 %v2683_v0  ;;  %2320 = vmatpush1.bf16.msra.mxu1 %v2319_v52  ;;  %v675_v45 = vld [vmem:[#allocation2 + $0x418] sm:$0xff]  ;;  %v2919_v52 = vld [vmem:[%s3222_s2] sm:$0xf]  ;;  %v678_v62 = vld [vmem:[#allocation2 + $0x430] sm:$0xff] }
  0x5f   :  { %1951 = vmatmul.mubr.msk.f32.gmra.mrb[22].mxu0 %vm109_vm0, %v66_v38  ;;  %2322 = vmatprep.subr.bf16.mxu1 %v2321_v54  ;;  %v2341_v48 = vpack.c.bf16 %v679_v47, %v675_v45  ;;  %v680_v9 = vld [vmem:[#allocation2 + $0x440] sm:$0xff]  ;;  %v689_v18 = vld [vmem:[#allocation2 + $0x488] sm:$0xff]  ;;  %v695_v22 = vld [vmem:[#allocation2 + $0x4b8] sm:$0xff] }
  0x60   :  { %294 = vmatprep.mubr.f32.mxu0 %v2683_v0  ;;  %2196 = vmatpush1.bf16.msra.mxu0 %v2195_v53  ;;  %v95_v53 = vsub.s32 1, %v2913_v50  ;;  %v684_v10 = vld [vmem:[#allocation2 + $0x460] sm:$0xff]  ;;  %v693_v20 = vld [vmem:[#allocation2 + $0x4a8] sm:$0xff]  ;;  %v690_v36 = vld [vmem:[#allocation2 + $0x490] sm:$0xff] }
  0x61   :  { %1967 = vmatmul.mubr.msk.f32.gmra.mrb[22].mxu1 %vm109_vm0, %v66_v38  ;;  %2198 = vmatprep.subr.bf16.mxu0 %v2197_v58  ;;  %v671_v38 = vld [vmem:[#allocation2 + $0x3f8] sm:$0xff]  ;;  %v676_v58 = vld [vmem:[#allocation2 + $0x420] sm:$0xff]  ;;  %v694_v37 = vld [vmem:[#allocation2 + $0x4b0] sm:$0xff] }
  0x62   :  { %455 = vmatprep.mubr.f32.mxu1 %v2683_v0  ;;  %2324 = vmatpush1.bf16.msra.mxu1 %v2323_v2  ;;  %v2337_v40 = vpack.c.bf16 %v671_v38, %v667_v34  ;;  %v2930_v55 = vrot.slane %v2919_v52, %v95_v53  ;;  %v685_v2 = vld [vmem:[#allocation2 + $0x468] sm:$0xff]  ;;  %v2215_v7 = vpack.c.bf16 %v676_v58, %v672_v57  ;;  %v692_v29 = vld [vmem:[#allocation2 + $0x4a0] sm:$0xff]  ;;  %v699_v41 = vld [vmem:[#allocation2 + $0x4d8] sm:$0xff] }
  0x63   :  { %1952 = vmatmul.mubr.msk.f32.gmra.mrb[24].mxu0 %vm109_vm0, %v67_v51  ;;  %2326 = vmatprep.subr.bf16.mxu1 %v2325_v4  ;;  %v687_v4 = vld [vmem:[#allocation2 + $0x478] sm:$0xff]  ;;  %v2221_v34 = vpack.c.bf16 %v693_v20, %v689_v18  ;;  %v697_v38 = vld [vmem:[#allocation2 + $0x4c8] sm:$0xff]  ;;  %v696_v47 = vld [vmem:[#allocation2 + $0x4c0] sm:$0xff] }
  0x64   :  { %300 = vmatprep.mubr.f32.mxu0 %v2683_v0  ;;  %2200 = vmatpush1.bf16.msra.mxu0 %v2199_v3  ;;  %v683_v3 = vld [vmem:[#allocation2 + $0x458] sm:$0xff]  ;;  %v706_v18 = vld [vmem:[#allocation2 + $0x510] sm:$0xff]  ;;  %v713_v20 = vld [vmem:[#allocation2 + $0x548] sm:$0xff] }
  0x65   :  { %1968 = vmatmul.mubr.msk.f32.gmra.mrb[24].mxu1 %vm109_vm0, %v67_v51  ;;  %2202 = vmatprep.subr.bf16.mxu0 %v2201_v8  ;;  %v91_v51 = vsub.s32 0, %v2913_v50  ;;  %v2343_v8 = vpack.c.bf16 %v678_v62, %v674_v61  ;;  %v703_v42 = vld [vmem:[#allocation2 + $0x4f8] sm:$0xff]  ;;  %v698_v61 = vld [vmem:[#allocation2 + $0x4d0] sm:$0xff] }
  0x66   :  { %461 = vmatprep.mubr.f32.mxu1 %v2683_v0  ;;  %2328 = vmatpush1.bf16.msra.mxu1 %v2327_v15  ;;  %v2345_v15 = vpack.c.bf16 %v687_v4, %v683_v3  ;;  %v702_v62 = vld [vmem:[#allocation2 + $0x4f0] sm:$0xff]  ;;  %v707_v3 = vld [vmem:[#allocation2 + $0x518] sm:$0xff] }
  0x67   :  { %1953 = vmatmul.mubr.msk.f32.gmra.mrb[26].mxu0 %vm109_vm0, %v68_v1  ;;  %2330 = vmatprep.subr.bf16.mxu1 %v2329_v17  ;;  %v2925_v54 = vrot.slane %v2919_v52, %v91_v51  ;;  %v686_v17 = vld [vmem:[#allocation2 + $0x470] sm:$0xff]  ;;  %v711_v4 = vld [vmem:[#allocation2 + $0x538] sm:$0xff] }
  0x68   :  { %306 = vmatprep.mubr.f32.mxu0 %v2683_v0  ;;  %2204 = vmatpush1.bf16.msra.mxu0 %v2203_v16  ;;  %v682_v16 = vld [vmem:[#allocation2 + $0x450] sm:$0xff] }
  0x69   :  { %1969 = vmatmul.mubr.msk.f32.gmra.mrb[26].mxu1 %vm109_vm0, %v68_v1  ;;  %2206 = vmatprep.subr.bf16.mxu0 %v2205_v21  ;;  %v691_v21 = vld [vmem:[#allocation2 + $0x498] sm:$0xff] }
  0x6a   :  { %467 = vmatprep.mubr.f32.mxu1 %v2683_v0  ;;  %2332 = vmatpush1.bf16.msra.mxu1 %v2331_v26  ;;  %v2219_v26 = vpack.c.bf16 %v684_v10, %v680_v9  ;;  %v2355_v9 = vpack.c.bf16 %v702_v62, %v698_v61  ;;  %v704_v10 = vld [vmem:[#allocation2 + $0x500] sm:$0xff] }
  0x6b   :  { %1954 = vmatmul.mubr.msk.f32.gmra.mrb[28].mxu0 %vm109_vm0, %v69_v14  ;;  %2334 = vmatprep.subr.bf16.mxu1 %v2333_v28  ;;  %v688_v28 = vld [vmem:[#allocation2 + $0x480] sm:$0xff] }
  0x6c   :  { %312 = vmatprep.mubr.f32.mxu0 %v2683_v0  ;;  %2208 = vmatpush1.bf16.msra.mxu0 %v2207_v27  ;;  %v2347_v27 = vpack.c.bf16 %v686_v17, %v682_v16  ;;  %v2223_v45 = vpack.c.bf16 %v692_v29, %v688_v28  ;;  %v2357_v17 = vpack.c.bf16 %v711_v4, %v707_v3  ;;  %v722_v4 = vld [vmem:[#allocation2 + $0x590] sm:$0xff] }
  0x6d   :  { %1970 = vmatmul.mubr.msk.f32.gmra.mrb[28].mxu1 %vm109_vm0, %v69_v14  ;;  %2210 = vmatprep.subr.bf16.mxu0 %v2209_v35  ;;  %v2217_v14 = vpack.c.bf16 %v685_v2, %v681_v63  ;;  %v2349_v35 = vpack.c.bf16 %v695_v22, %v691_v21  ;;  %v705_v63 = vld [vmem:[#allocation2 + $0x508] sm:$0xff] }
  0x6e   :  { %473 = vmatprep.mubr.f32.mxu1 %v2683_v0  ;;  %2336 = vmatpush1.bf16.msra.mxu1 %v2335_v31  ;;  %v673_v0 = vld [vmem:[#allocation2 + $0x408] sm:$0xff] }
  0x6f   :  { %1955 = vmatmul.mubr.msk.f32.gmra.mrb[30].mxu0 %vm109_vm0, %v70_v25  ;;  %2338 = vmatprep.subr.bf16.mxu1 %v2337_v40  ;;  %v2213_v46 = vpack.c.bf16 %v677_v44, %v673_v0  ;;  %v701_v40 = vld [vmem:[#allocation2 + $0x4e8] sm:$0xff] }
  0x70   :  { %2212 = vmatpush1.bf16.msra.mxu0 %v2211_v39  ;;  %v709_v2 = vld [vmem:[#allocation2 + $0x528] sm:$0xff] }
  0x71   :  { %1971 = vmatmul.mubr.msk.f32.gmra.mrb[30].mxu1 %vm109_vm0, %v70_v25  ;;  %2214 = vmatprep.subr.bf16.mxu0 %v2213_v46  ;;  %v2351_v46 = vpack.c.bf16 %v694_v37, %v690_v36  ;;  %v2229_v16 = vpack.c.bf16 %v709_v2, %v705_v63  ;;  %v717_v22 = vld [vmem:[#allocation2 + $0x568] sm:$0xff] }
  0x72   :  { %2340 = vmatpush1.bf16.msra.mxu1 %v2339_v43 }
  0x73   :  { %2342 = vmatprep.subr.bf16.mxu1 %v2341_v48  ;;  %v700_v48 = vld [vmem:[#allocation2 + $0x4e0] sm:$0xff] }
 0x106   :  { %v224_v56 = vpop.f32.mrb[0].mxu0 }
 0x107   :  { %v225_v59 = vadd.f32 %v224_v56, %v2925_v54  ;;  %v226_v60 = vpop.f32.mrb[1].mxu0 }
 0x108   :  { %v227_v1 = vadd.f32 %v226_v60, %v2930_v55  ;;  %v2936_v23 = vpop.f32.mrb[0].mxu1  ;;  %v2353_v60 = vpack.c.bf16 %v703_v42, %v699_v41  ;;  %v718_v41 = vld [vmem:[#allocation2 + $0x570] sm:$0xff]  ;;  %v721_v42 = vld [vmem:[#allocation2 + $0x588] sm:$0xff] }
 0x109   :  { %v480_v11 = vmax.f32 %v225_v59, 0.0  ;;  %v2938_v30 = vpop.f32.mrb[1].mxu1  ;;  %v2225_v59 = vpack.c.bf16 %v701_v40, %v697_v38  ;;  %v2233_v38 = vpack.c.bf16 %v717_v22, %v713_v20  ;;  %v714_v40 = vld [vmem:[#allocation2 + $0x550] sm:$0xff] }
 0x10a   :  { %v481_v5 = vmax.f32 %v227_v1, 0.0  ;;  %v230_v6 = vpop.f32.mrb[2].mxu0 }
 0x10b   :  { %v231_v12 = vadd.f32 %v230_v6, %v2925_v54  ;;  %v232_v13 = vpop.f32.mrb[3].mxu0 }
 0x10c   :  { %v233_v19 = vadd.f32 %v232_v13, %v2930_v55  ;;  %886 = vmatprep.mubr.f32.mxu0 %v481_v5  ;;  %1208 = vmatprep.mubr.f32.mxu1 %v481_v5  ;;  %v2942_v43 = vpop.f32.mrb[2].mxu1 }
 0x10d   :  { %887 = vmatmul.mubr.f32.vlgmr.msra.gmra.mrb[32].mxu0 %v480_v11  ;;  %1209 = vmatmul.mubr.f32.vlgmr.msra.gmra.mrb[32].mxu1 %v480_v11  ;;  %v484_v31 = vmax.f32 %v231_v12, 0.0  ;;  %v2944_v49 = vpop.f32.mrb[3].mxu1  ;;  %v708_v11 = vld [vmem:[#allocation2 + $0x520] sm:$0xff] }
 0x10e   :  { %v485_v24 = vmax.f32 %v233_v19, 0.0  ;;  %2216 = vmatpush1.bf16.msra.mxu0 %v2215_v7  ;;  %v236_v25 = vpop.f32.mrb[4].mxu0  ;;  %2344 = vmatpush1.bf16.msra.mxu1 %v2343_v8  ;;  %v2227_v8 = vpack.c.bf16 %v700_v48, %v696_v47  ;;  %v710_v19 = vld [vmem:[#allocation2 + $0x530] sm:$0xff]  ;;  %v2231_v29 = vpack.c.bf16 %v708_v11, %v704_v10  ;;  %v731_v10 = vld [vmem:[#allocation2 + $0x5d8] sm:$0xff] }
 0x10f   :  { %v237_v32 = vadd.f32 %v236_v25, %v2925_v54  ;;  %v238_v33 = vpop.f32.mrb[5].mxu0  ;;  %2218 = vmatprep.subr.bf16.mxu0 %v2217_v14  ;;  %2346 = vmatprep.subr.bf16.mxu1 %v2345_v15  ;;  %v719_v25 = vld [vmem:[#allocation2 + $0x578] sm:$0xff] }
 0x110   :  { %v239_v39 = vadd.f32 %v238_v33, %v2930_v55  ;;  %892 = vmatprep.mubr.f32.mxu0 %v485_v24  ;;  %1214 = vmatprep.mubr.f32.mxu1 %v485_v24  ;;  %v2948_v5 = vpop.f32.mrb[4].mxu1  ;;  %v715_v24 = vld [vmem:[#allocation2 + $0x558] sm:$0xff]  ;;  %v716_v33 = vld [vmem:[#allocation2 + $0x560] sm:$0xff] }
 0x111   :  { %893 = vmatmul.mubr.f32.gmra.mrb[34].mxu0 %v484_v31  ;;  %1215 = vmatmul.mubr.f32.gmra.mrb[34].mxu1 %v484_v31  ;;  %v488_v56 = vmax.f32 %v237_v32, 0.0  ;;  %v2950_v12 = vpop.f32.mrb[5].mxu1  ;;  %v2359_v31 = vpack.c.bf16 %v710_v19, %v706_v18  ;;  %v712_v32 = vld [vmem:[#allocation2 + $0x540] sm:$0xff]  ;;  %v735_v11 = vld [vmem:[#allocation2 + $0x5f8] sm:$0xff] }
 0x112   :  { %v489_v0 = vmax.f32 %v239_v39, 0.0  ;;  %2220 = vmatpush1.bf16.msra.mxu0 %v2219_v26  ;;  %v242_v44 = vpop.f32.mrb[6].mxu0  ;;  %2348 = vmatpush1.bf16.msra.mxu1 %v2347_v27  ;;  %v2361_v39 = vpack.c.bf16 %v719_v25, %v715_v24  ;;  %v728_v18 = vld [vmem:[#allocation2 + $0x5c0] sm:$0xff] }
 0x113   :  { %v243_v57 = vadd.f32 %v242_v44, %v2925_v54  ;;  %v244_v58 = vpop.f32.mrb[7].mxu0  ;;  %2222 = vmatprep.subr.bf16.mxu0 %v2221_v34  ;;  %2350 = vmatprep.subr.bf16.mxu1 %v2349_v35  ;;  %v725_v44 = vld [vmem:[#allocation2 + $0x5a8] sm:$0xff]  ;;  %v732_v19 = vld [vmem:[#allocation2 + $0x5e0] sm:$0xff] }
 0x114   :  { %v245_v1 = vadd.f32 %v244_v58, %v2930_v55  ;;  %898 = vmatprep.mubr.f32.mxu0 %v489_v0  ;;  %1220 = vmatprep.mubr.f32.mxu1 %v489_v0  ;;  %v2954_v26 = vpop.f32.mrb[6].mxu1  ;;  %v2363_v58 = vpack.c.bf16 %v718_v41, %v714_v40  ;;  %v2237_v2 = vpack.c.bf16 %v725_v44, %v721_v42  ;;  %v736_v42 = vld [vmem:[#allocation2 + $0x600] sm:$0xff] }
 0x115   :  { %899 = vmatmul.mubr.f32.gmra.mrb[36].mxu0 %v488_v56  ;;  %1221 = vmatmul.mubr.f32.gmra.mrb[36].mxu1 %v488_v56  ;;  %v492_v13 = vmax.f32 %v243_v57, 0.0  ;;  %v2956_v34 = vpop.f32.mrb[7].mxu1  ;;  %v2235_v57 = vpack.c.bf16 %v716_v33, %v712_v32  ;;  %v741_v33 = vld [vmem:[#allocation2 + $0x628] sm:$0xff]  ;;  %v2243_v40 = vpack.c.bf16 %v732_v19, %v728_v18  ;;  %v746_v19 = vld [vmem:[#allocation2 + $0x650] sm:$0xff] }
 0x116   :  { %v493_v6 = vmax.f32 %v245_v1, 0.0  ;;  %2224 = vmatpush1.bf16.msra.mxu0 %v2223_v45  ;;  %v248_v7 = vpop.f32.mrb[8].mxu0  ;;  %2352 = vmatpush1.bf16.msra.mxu1 %v2351_v46  ;;  %v723_v45 = vld [vmem:[#allocation2 + $0x598] sm:$0xff] }
 0x117   :  { %v249_v14 = vadd.f32 %v248_v7, %v2925_v54  ;;  %v250_v15 = vpop.f32.mrb[9].mxu0  ;;  %2226 = vmatprep.subr.bf16.mxu0 %v2225_v59  ;;  %2354 = vmatprep.subr.bf16.mxu1 %v2353_v60  ;;  %v727_v46 = vld [vmem:[#allocation2 + $0x5b8] sm:$0xff]  ;;  %v720_v59 = vld [vmem:[#allocation2 + $0x580] sm:$0xff]  ;;  %v729_v7 = vld [vmem:[#allocation2 + $0x5c8] sm:$0xff] }
 0x118   :  { %v251_v21 = vadd.f32 %v250_v15, %v2930_v55  ;;  %904 = vmatprep.mubr.f32.mxu0 %v493_v6  ;;  %1226 = vmatprep.mubr.f32.mxu1 %v493_v6  ;;  %v2960_v47 = vpop.f32.mrb[8].mxu1  ;;  %v724_v60 = vld [vmem:[#allocation2 + $0x5a0] sm:$0xff]  ;;  %v2365_v3 = vpack.c.bf16 %v727_v46, %v723_v45  ;;  %v726_v6 = vld [vmem:[#allocation2 + $0x5b0] sm:$0xff] }
 0x119   :  { %905 = vmatmul.mubr.f32.gmra.mrb[38].mxu0 %v492_v13  ;;  %1227 = vmatmul.mubr.f32.gmra.mrb[38].mxu1 %v492_v13  ;;  %v496_v35 = vmax.f32 %v249_v14, 0.0  ;;  %v2962_v61 = vpop.f32.mrb[9].mxu1 }
 0x11a   :  { %v497_v27 = vmax.f32 %v251_v21, 0.0  ;;  %2228 = vmatpush1.bf16.msra.mxu0 %v2227_v8  ;;  %v254_v28 = vpop.f32.mrb[10].mxu0  ;;  %2356 = vmatpush1.bf16.msra.mxu1 %v2355_v9  ;;  %v733_v9 = vld [vmem:[#allocation2 + $0x5e8] sm:$0xff] }
 0x11b   :  { %v255_v36 = vadd.f32 %v254_v28, %v2925_v54  ;;  %v256_v37 = vpop.f32.mrb[11].mxu0  ;;  %2230 = vmatprep.subr.bf16.mxu0 %v2229_v16  ;;  %2358 = vmatprep.subr.bf16.mxu1 %v2357_v17  ;;  %v2239_v16 = vpack.c.bf16 %v724_v60, %v720_v59  ;;  %v2367_v17 = vpack.c.bf16 %v726_v6, %v722_v4  ;;  %v730_v28 = vld [vmem:[#allocation2 + $0x5d0] sm:$0xff]  ;;  %v745_v60 = vld [vmem:[#allocation2 + $0x648] sm:$0xff] }
 0x11c   :  { %v257_v0 = vadd.f32 %v256_v37, %v2930_v55  ;;  %910 = vmatprep.mubr.f32.mxu0 %v497_v27  ;;  %1232 = vmatprep.mubr.f32.mxu1 %v497_v27  ;;  %v2966_v13 = vpop.f32.mrb[10].mxu1  ;;  %v2241_v25 = vpack.c.bf16 %v733_v9, %v729_v7  ;;  %v2369_v27 = vpack.c.bf16 %v735_v11, %v731_v10  ;;  %v742_v59 = vld [vmem:[#allocation2 + $0x630] sm:$0xff]  ;;  %v744_v9 = vld [vmem:[#allocation2 + $0x640] sm:$0xff] }
 0x11d   :  { %911 = vmatmul.mubr.f32.gmra.mrb[40].mxu0 %v496_v35  ;;  %1233 = vmatmul.mubr.f32.gmra.mrb[40].mxu1 %v496_v35  ;;  %v500_v62 = vmax.f32 %v255_v36, 0.0  ;;  %v2968_v20 = vpop.f32.mrb[11].mxu1  ;;  %v739_v35 = vld [vmem:[#allocation2 + $0x618] sm:$0xff]  ;;  %v748_v10 = vld [vmem:[#allocation2 + $0x660] sm:$0xff] }
 0x11e   :  { %v501_v48 = vmax.f32 %v257_v0, 0.0  ;;  %2232 = vmatpush1.bf16.msra.mxu0 %v2231_v29  ;;  %v260_v56 = vpop.f32.mrb[12].mxu0  ;;  %2360 = vmatpush1.bf16.msra.mxu1 %v2359_v31  ;;  %v734_v29 = vld [vmem:[#allocation2 + $0x5f0] sm:$0xff]  ;;  %v737_v31 = vld [vmem:[#allocation2 + $0x608] sm:$0xff]  ;;  %v743_v36 = vld [vmem:[#allocation2 + $0x638] sm:$0xff] }
 0x11f   :  { %v261_v63 = vadd.f32 %v260_v56, %v2925_v54  ;;  %v262_v1 = vpop.f32.mrb[13].mxu0  ;;  %2234 = vmatprep.subr.bf16.mxu0 %v2233_v38  ;;  %2362 = vmatprep.subr.bf16.mxu1 %v2361_v39  ;;  %v2371_v41 = vpack.c.bf16 %v734_v29, %v730_v28  ;;  %v740_v0 = vld [vmem:[#allocation2 + $0x620] sm:$0xff]  ;;  %v2245_v56 = vpack.c.bf16 %v741_v33, %v737_v31  ;;  %v759_v28 = vld [vmem:[#allocation2 + $0x6b8] sm:$0xff] }
 0x120   :  { %v263_v8 = vadd.f32 %v262_v1, %v2930_v55  ;;  %916 = vmatprep.mubr.f32.mxu0 %v501_v48  ;;  %1238 = vmatprep.mubr.f32.mxu1 %v501_v48  ;;  %v2972_v37 = vpop.f32.mrb[12].mxu1  ;;  %v747_v1 = vld [vmem:[#allocation2 + $0x658] sm:$0xff]  ;;  %v2247_v7 = vpack.c.bf16 %v740_v0, %v736_v42  ;;  %v2251_v33 = vpack.c.bf16 %v748_v10, %v744_v9 }
 0x121   :  { %917 = vmatmul.mubr.f32.gmra.mrb[42].mxu0 %v500_v62  ;;  %1239 = vmatmul.mubr.f32.gmra.mrb[42].mxu1 %v500_v62  ;;  %v504_v21 = vmax.f32 %v261_v63, 0.0  ;;  %v2974_v44 = vpop.f32.mrb[13].mxu1  ;;  %v749_v63 = vld [vmem:[#allocation2 + $0x668] sm:$0xff] }
 0x122   :  { %v505_v14 = vmax.f32 %v263_v8, 0.0  ;;  %2236 = vmatpush1.bf16.msra.mxu0 %v2235_v57  ;;  %v266_v15 = vpop.f32.mrb[14].mxu0  ;;  %2364 = vmatpush1.bf16.msra.mxu1 %v2363_v58  ;;  %v2373_v57 = vpack.c.bf16 %v743_v36, %v739_v35  ;;  %v738_v58 = vld [vmem:[#allocation2 + $0x610] sm:$0xff]  ;;  %v752_v36 = vld [vmem:[#allocation2 + $0x680] sm:$0xff] }
 0x123   :  { %v267_v22 = vadd.f32 %v266_v15, %v2925_v54  ;;  %v268_v24 = vpop.f32.mrb[15].mxu0  ;;  %2238 = vmatprep.subr.bf16.mxu0 %v2237_v2  ;;  %2366 = vmatprep.subr.bf16.mxu1 %v2365_v3  ;;  %v751_v2 = vld [vmem:[#allocation2 + $0x678] sm:$0xff]  ;;  %v2375_v8 = vpack.c.bf16 %v742_v59, %v738_v58  ;;  %v765_v58 = vld [vmem:[#allocation2 + $0x6e8] sm:$0xff] }
 0x124   :  { %v269_v32 = vadd.f32 %v268_v24, %v2930_v55  ;;  %922 = vmatprep.mubr.f32.mxu0 %v505_v14  ;;  %1244 = vmatprep.mubr.f32.mxu1 %v505_v14  ;;  %v2978_v3 = vpop.f32.mrb[14].mxu1  ;;  %v2377_v18 = vpack.c.bf16 %v751_v2, %v747_v1  ;;  %v763_v59 = vld [vmem:[#allocation2 + $0x6d8] sm:$0xff] }
 0x125   :  { %923 = vmatmul.mubr.f32.gmra.mrb[44].mxu0 %v504_v21  ;;  %1245 = vmatmul.mubr.f32.gmra.mrb[44].mxu1 %v504_v21  ;;  %v508_v45 = vmax.f32 %v267_v22, 0.0  ;;  %v2980_v11 = vpop.f32.mrb[15].mxu1  ;;  %v750_v21 = vld [vmem:[#allocation2 + $0x670] sm:$0xff]  ;;  %v753_v22 = vld [vmem:[#allocation2 + $0x688] sm:$0xff] }
 0x126   :  { %v509_v38 = vmax.f32 %v269_v32, 0.0  ;;  %2240 = vmatpush1.bf16.msra.mxu0 %v2239_v16  ;;  %v272_v39 = vpop.f32.mrb[16].mxu0  ;;  %2368 = vmatpush1.bf16.msra.mxu1 %v2367_v17  ;;  %v2249_v17 = vpack.c.bf16 %v749_v63, %v745_v60  ;;  %v2379_v35 = vpack.c.bf16 %v750_v21, %v746_v19  ;;  %v767_v60 = vld [vmem:[#allocation2 + $0x6f8] sm:$0xff]  ;;  %v769_v19 = vld [vmem:[#allocation2 + $0x708] sm:$0xff] }
 0x127   :  { %v273_v46 = vadd.f32 %v272_v39, %v2925_v54  ;;  %v274_v48 = vpop.f32.mrb[17].mxu0  ;;  %2242 = vmatprep.subr.bf16.mxu0 %v2241_v25  ;;  %2370 = vmatprep.subr.bf16.mxu1 %v2369_v27  ;;  %v757_v25 = vld [vmem:[#allocation2 + $0x6a8] sm:$0xff]  ;;  %v755_v27 = vld [vmem:[#allocation2 + $0x698] sm:$0xff] }
 0x128   :  { %v275_v62 = vadd.f32 %v274_v48, %v2930_v55  ;;  %928 = vmatprep.mubr.f32.mxu0 %v509_v38  ;;  %1250 = vmatprep.mubr.f32.mxu1 %v509_v38  ;;  %v2984_v29 = vpop.f32.mrb[16].mxu1  ;;  %v756_v38 = vld [vmem:[#allocation2 + $0x6a0] sm:$0xff]  ;;  %v2253_v0 = vpack.c.bf16 %v757_v25, %v753_v22  ;;  %v758_v48 = vld [vmem:[#allocation2 + $0x6b0] sm:$0xff]  ;;  %v773_v22 = vld [vmem:[#allocation2 + $0x728] sm:$0xff] }
 0x129   :  { %929 = vmatmul.mubr.f32.gmra.mrb[46].mxu0 %v508_v45  ;;  %1251 = vmatmul.mubr.f32.gmra.mrb[46].mxu1 %v508_v45  ;;  %v512_v14 = vmax.f32 %v273_v46, 0.0  ;;  %v2986_v39 = vpop.f32.mrb[17].mxu1  ;;  %v2381_v45 = vpack.c.bf16 %v759_v28, %v755_v27  ;;  %v754_v46 = vld [vmem:[#allocation2 + $0x690] sm:$0xff]  ;;  %v2255_v2 = vpack.c.bf16 %v756_v38, %v752_v36  ;;  %v775_v25 = vld [vmem:[#allocation2 + $0x738] sm:$0xff]  ;;  %v772_v36 = vld [vmem:[#allocation2 + $0x720] sm:$0xff] }
 0x12a   :  { %v513_v4 = vmax.f32 %v275_v62, 0.0  ;;  %2244 = vmatpush1.bf16.msra.mxu0 %v2243_v40  ;;  %v278_v6 = vpop.f32.mrb[18].mxu0  ;;  %2372 = vmatpush1.bf16.msra.mxu1 %v2371_v41  ;;  %v770_v38 = vld [vmem:[#allocation2 + $0x710] sm:$0xff] }
 0x12b   :  { %v279_v15 = vadd.f32 %v278_v6, %v2925_v54  ;;  %v280_v16 = vpop.f32.mrb[19].mxu0  ;;  %2246 = vmatprep.subr.bf16.mxu0 %v2245_v56  ;;  %2374 = vmatprep.subr.bf16.mxu1 %v2373_v57  ;;  %v761_v56 = vld [vmem:[#allocation2 + $0x6c8] sm:$0xff]  ;;  %v760_v6 = vld [vmem:[#allocation2 + $0x6c0] sm:$0xff] }
 0x12c   :  { %v281_v24 = vadd.f32 %v280_v16, %v2930_v55  ;;  %934 = vmatprep.mubr.f32.mxu0 %v513_v4  ;;  %1256 = vmatprep.mubr.f32.mxu1 %v513_v4  ;;  %v2990_v62 = vpop.f32.mrb[18].mxu1  ;;  %v2383_v4 = vpack.c.bf16 %v758_v48, %v754_v46  ;;  %v2385_v16 = vpack.c.bf16 %v767_v60, %v763_v59  ;;  %v774_v48 = vld [vmem:[#allocation2 + $0x730] sm:$0xff]  ;;  %v779_v59 = vld [vmem:[#allocation2 + $0x758] sm:$0xff] }
 0x12d   :  { %935 = vmatmul.mubr.f32.gmra.mrb[48].mxu0 %v512_v14  ;;  %1257 = vmatmul.mubr.f32.gmra.mrb[48].mxu1 %v512_v14  ;;  %v516_v40 = vmax.f32 %v279_v15, 0.0  ;;  %v2257_v15 = vpack.c.bf16 %v765_v58, %v761_v56  ;;  %v777_v56 = vld [vmem:[#allocation2 + $0x748] sm:$0xff]  ;;  %v783_v60 = vld [vmem:[#allocation2 + $0x778] sm:$0xff] }
 0x12e   :  { %v517_v31 = vmax.f32 %v281_v24, 0.0  ;;  %2248 = vmatpush1.bf16.msra.mxu0 %v2247_v7  ;;  %v284_v32 = vpop.f32.mrb[20].mxu0  ;;  %2376 = vmatpush1.bf16.msra.mxu1 %v2375_v8  ;;  %v764_v7 = vld [vmem:[#allocation2 + $0x6e0] sm:$0xff]  ;;  %v2992_v8 = vpop.f32.mrb[19].mxu1  ;;  %v771_v24 = vld [vmem:[#allocation2 + $0x718] sm:$0xff] }
 0x12f   :  { %v285_v41 = vadd.f32 %v284_v32, %v2925_v54  ;;  %v286_v42 = vpop.f32.mrb[21].mxu0  ;;  %2250 = vmatprep.subr.bf16.mxu0 %v2249_v17  ;;  %2378 = vmatprep.subr.bf16.mxu1 %v2377_v18  ;;  %v762_v17 = vld [vmem:[#allocation2 + $0x6d0] sm:$0xff]  ;;  %v2259_v32 = vpack.c.bf16 %v764_v7, %v760_v6  ;;  %v2389_v46 = vpack.c.bf16 %v775_v25, %v771_v24  ;;  %v789_v24 = vld [vmem:[#allocation2 + $0x7a8] sm:$0xff]  ;;  %v103_v25 = vsub.s32 3, %v2913_v50 }
 0x130   :  { %v287_v57 = vadd.f32 %v286_v42, %v2930_v55  ;;  %940 = vmatprep.mubr.f32.mxu0 %v517_v31  ;;  %1262 = vmatprep.mubr.f32.mxu1 %v517_v31  ;;  %v766_v18 = vld [vmem:[#allocation2 + $0x6f0] sm:$0xff]  ;;  %v2996_v27 = vpop.f32.mrb[20].mxu1  ;;  %v2391_v6 = vpack.c.bf16 %v774_v48, %v770_v38 }
 0x131   :  { %941 = vmatmul.mubr.f32.gmra.mrb[50].mxu0 %v516_v40  ;;  %1263 = vmatmul.mubr.f32.gmra.mrb[50].mxu1 %v516_v40  ;;  %v520_v9 = vmax.f32 %v285_v41, 0.0  ;;  %v2998_v40 = vpop.f32.mrb[21].mxu1  ;;  %v786_v48 = vld [vmem:[#allocation2 + $0x790] sm:$0xff] }
 0x132   :  { %v521_v63 = vmax.f32 %v287_v57, 0.0  ;;  %2252 = vmatpush1.bf16.msra.mxu0 %v2251_v33  ;;  %v290_v1 = vpop.f32.mrb[22].mxu0  ;;  %2380 = vmatpush1.bf16.msra.mxu1 %v2379_v35  ;;  %v2387_v33 = vpack.c.bf16 %v766_v18, %v762_v17  ;;  %v768_v35 = vld [vmem:[#allocation2 + $0x700] sm:$0xff]  ;;  %v781_v57 = vld [vmem:[#allocation2 + $0x768] sm:$0xff] }
 0x133   :  { %v291_v10 = vadd.f32 %v290_v1, %v2925_v54  ;;  %v292_v14 = vpop.f32.mrb[23].mxu0  ;;  %2254 = vmatprep.subr.bf16.mxu0 %v2253_v0  ;;  %2382 = vmatprep.subr.bf16.mxu1 %v2381_v45  ;;  %v2261_v45 = vpack.c.bf16 %v773_v22, %v769_v19  ;;  %v2265_v7 = vpack.c.bf16 %v781_v57, %v777_v56  ;;  %v785_v22 = vld [vmem:[#allocation2 + $0x788] sm:$0xff] }
 0x134   :  { %v293_v21 = vadd.f32 %v292_v14, %v2930_v55  ;;  %946 = vmatprep.mubr.f32.mxu0 %v521_v63  ;;  %1268 = vmatprep.mubr.f32.mxu1 %v521_v63  ;;  %v3002_v63 = vpop.f32.mrb[22].mxu1  ;;  %v778_v14 = vld [vmem:[#allocation2 + $0x750] sm:$0xff]  ;;  %v2393_v19 = vpack.c.bf16 %v783_v60, %v779_v59 }
 0x135   :  { %947 = vmatmul.mubr.f32.gmra.mrb[52].mxu0 %v520_v9  ;;  %1269 = vmatmul.mubr.f32.gmra.mrb[52].mxu1 %v520_v9  ;;  %v524_v41 = vmax.f32 %v291_v10, 0.0  ;;  %v776_v9 = vld [vmem:[#allocation2 + $0x740] sm:$0xff] }
 0x136   :  { %v525_v28 = vmax.f32 %v293_v21, 0.0  ;;  %2256 = vmatpush1.bf16.msra.mxu0 %v2255_v2  ;;  %v296_v31 = vpop.f32.mrb[24].mxu0  ;;  %2384 = vmatpush1.bf16.msra.mxu1 %v2383_v4  ;;  %v2263_v4 = vpack.c.bf16 %v772_v36, %v768_v35  ;;  %v780_v10 = vld [vmem:[#allocation2 + $0x760] sm:$0xff]  ;;  %v782_v21 = vld [vmem:[#allocation2 + $0x770] sm:$0xff] }
 0x137   :  { %v297_v42 = vadd.f32 %v296_v31, %v2925_v54  ;;  %v298_v0 = vpop.f32.mrb[25].mxu0  ;;  %2258 = vmatprep.subr.bf16.mxu0 %v2257_v15  ;;  %2386 = vmatprep.subr.bf16.mxu1 %v2385_v16  ;;  %v3004_v15 = vpop.f32.mrb[23].mxu1  ;;  %v787_v31 = vld [vmem:[#allocation2 + $0x798] sm:$0xff] }
 0x138   :  { %v299_v58 = vadd.f32 %v298_v0, %v2930_v55  ;;  %952 = vmatprep.mubr.f32.mxu0 %v525_v28  ;;  %1274 = vmatprep.mubr.f32.mxu1 %v525_v28  ;;  %v3010_v35 = vpop.f32.mrb[24].mxu1  ;;  %v2269_v0 = vpack.c.bf16 %v789_v24, %v785_v22  ;;  %v792_v24 = vld [vmem:[#allocation2 + $0x7c0] sm:$0xff] }
 0x139   :  { %953 = vmatmul.mubr.f32.gmra.mrb[54].mxu0 %v524_v41  ;;  %1275 = vmatmul.mubr.f32.gmra.mrb[54].mxu1 %v524_v41  ;;  %v528_v16 = vmax.f32 %v297_v42, 0.0  ;;  %v2267_v41 = vpack.c.bf16 %v780_v10, %v776_v9  ;;  %v2395_v42 = vpack.c.bf16 %v782_v21, %v778_v14  ;;  %v3012_v56 = vpop.f32.mrb[25].mxu1  ;;  %v795_v10 = vld [vmem:[#allocation2 + $0x7d8] sm:$0xff] }
 0x13a   :  { %v529_v1 = vmax.f32 %v299_v58, 0.0  ;;  %2260 = vmatpush1.bf16.msra.mxu0 %v2259_v32  ;;  %v302_v2 = vpop.f32.mrb[26].mxu0  ;;  %2388 = vmatpush1.bf16.msra.mxu1 %v2387_v33  ;;  %v791_v32 = vld [vmem:[#allocation2 + $0x7b8] sm:$0xff]  ;;  %v99_v33 = vsub.s32 2, %v2913_v50 }
 0x13b   :  { %v303_v17 = vadd.f32 %v302_v2, %v2925_v54  ;;  %v304_v18 = vpop.f32.mrb[27].mxu0  ;;  %2262 = vmatprep.subr.bf16.mxu0 %v2261_v45  ;;  %2390 = vmatprep.subr.bf16.mxu1 %v2389_v46  ;;  %v784_v45 = vld [vmem:[#allocation2 + $0x780] sm:$0xff]  ;;  %v2397_v60 = vpack.c.bf16 %v791_v32, %v787_v31  ;;  %v790_v2 = vld [vmem:[#allocation2 + $0x7b0] sm:$0xff]  ;;  %v799_v14 = vld [vmem:[#allocation2 + $0x7f8] sm:$0xff] }
 0x13c   :  { %v305_v28 = vadd.f32 %v304_v18, %v2930_v55  ;;  %958 = vmatprep.mubr.f32.mxu0 %v529_v1  ;;  %1280 = vmatprep.mubr.f32.mxu1 %v529_v1  ;;  %v788_v46 = vld [vmem:[#allocation2 + $0x7a0] sm:$0xff]  ;;  %v3018_v1 = vrot.slane %v2919_v52, %v103_v25  ;;  %v2399_v21 = vpack.c.bf16 %v790_v2, %v786_v48 }
 0x13d   :  { %959 = vmatmul.mubr.f32.gmra.mrb[56].mxu0 %v528_v16  ;;  %1281 = vmatmul.mubr.f32.gmra.mrb[56].mxu1 %v528_v16  ;;  %v532_v57 = vmax.f32 %v303_v17, 0.0  ;;  %v2271_v16 = vpack.c.bf16 %v788_v46, %v784_v45  ;;  %v794_v45 = vld [vmem:[#allocation2 + $0x7d0] sm:$0xff]  ;;  %v1546_v48 = vld [vmem:[#allocation5 + $0x80] sm:$0xff] }
 0x13e   :  { %v533_v36 = vmax.f32 %v305_v28, 0.0  ;;  %2264 = vmatpush1.bf16.msra.mxu0 %v2263_v4  ;;  %v308_v38 = vpop.f32.mrb[28].mxu0  ;;  %2392 = vmatpush1.bf16.msra.mxu1 %v2391_v6  ;;  %v793_v4 = vld [vmem:[#allocation2 + $0x7c8] sm:$0xff]  ;;  %v798_v46 = vld [vmem:[#allocation2 + $0x7f0] sm:$0xff] }
 0x13f   :  { %v309_v58 = vadd.f32 %v308_v38, %v2925_v54  ;;  %v310_v59 = vpop.f32.mrb[29].mxu0  ;;  %2266 = vmatprep.subr.bf16.mxu0 %v2265_v7  ;;  %2394 = vmatprep.subr.bf16.mxu1 %v2393_v19  ;;  %v797_v6 = vld [vmem:[#allocation2 + $0x7e8] sm:$0xff]  ;;  %v3021_v7 = vpop.f32.mrb[26].mxu1  ;;  %v3026_v19 = vrot.slane %v2919_v52, %v99_v33  ;;  %v388_v38 = vadd.f32 %v2938_v30, %v3018_v1 }
 0x140   :  { %v311_v9 = vadd.f32 %v310_v59, %v2930_v55  ;;  %964 = vmatprep.mubr.f32.mxu0 %v533_v36  ;;  %1286 = vmatprep.mubr.f32.mxu1 %v533_v36  ;;  %v2273_v22 = vpack.c.bf16 %v797_v6, %v793_v4  ;;  %v3028_v28 = vpop.f32.mrb[27].mxu1  ;;  %v2403_v2 = vpack.c.bf16 %v798_v46, %v794_v45 }
 0x141   :  { %965 = vmatmul.mubr.f32.gmra.mrb[58].mxu0 %v532_v57  ;;  %1287 = vmatmul.mubr.f32.gmra.mrb[58].mxu1 %v532_v57  ;;  %v536_v31 = vmax.f32 %v309_v58, 0.0  ;;  %v3034_v57 = vpop.f32.mrb[28].mxu1  ;;  %v1578_v58 = vld [vmem:[#allocation5 + $0x180] sm:$0xff]  ;;  %v386_v6 = vadd.f32 %v2936_v23, %v3026_v19 }
 0x142   :  { %v537_v17 = vmax.f32 %v311_v9, 0.0  ;;  %2268 = vmatpush1.bf16.msra.mxu0 %v2267_v41  ;;  %v314_v18 = vpop.f32.mrb[30].mxu0  ;;  %2396 = vmatpush1.bf16.msra.mxu1 %v2395_v42  ;;  %v796_v41 = vld [vmem:[#allocation2 + $0x7e0] sm:$0xff]  ;;  %v2401_v42 = vpack.c.bf16 %v799_v14, %v795_v10  ;;  %v3038_v4 = vpop.f32.mrb[29].mxu1  ;;  %v483_v9 = vmax.f32 %v388_v38, 0.0  ;;  %v1531_v14 = vld [vmem:[#allocation5 + $0x8] sm:$0xff] }
 0x143   :  { %v315_v32 = vadd.f32 %v314_v18, %v2925_v54  ;;  %v316_v36 = vpop.f32.mrb[31].mxu0  ;;  %2270 = vmatprep.subr.bf16.mxu0 %v2269_v0  ;;  %2398 = vmatprep.subr.bf16.mxu1 %v2397_v60  ;;  %v1547_v54 = vld [vmem:[#allocation5 + $0x88] sm:$0xff]  ;;  %v2275_v30 = vpack.c.bf16 %v796_v41, %v792_v24  ;;  %v394_v60 = vadd.f32 %v2944_v49, %v3018_v1  ;;  %v1530_v10 = vld [vmem:[#allocation5] sm:$0xff]  ;;  %v1548_v24 = vld [vmem:[#allocation5 + $0x90] sm:$0xff]  ;;  %v482_v41 = vmax.f32 %v386_v6, 0.0 }
 0x144   :  { %v317_v52 = vadd.f32 %v316_v36, %v2930_v55  ;;  %970 = vmatprep.mubr.f32.mxu0 %v537_v17  ;;  %1292 = vmatprep.mubr.f32.mxu1 %v537_v17  ;;  %v1579_v0 = vld [vmem:[#allocation5 + $0x188] sm:$0xff]  ;;  %v1562_v18 = vld [vmem:[#allocation5 + $0x100] sm:$0xff]  ;;  %v3042_v49 = vpop.f32.mrb[30].mxu1  ;;  %v1581_v36 = vld [vmem:[#allocation5 + $0x198] sm:$0xff]  ;;  %v2407_v45 = vpack.c.bf16 %v1531_v14, %v1530_v10 }
 0x145   :  { %971 = vmatmul.mubr.f32.gmra.mrb[60].mxu0 %v536_v31  ;;  %1293 = vmatmul.mubr.f32.gmra.mrb[60].mxu1 %v536_v31  ;;  %v540_v55 = vmax.f32 %v315_v32, 0.0  ;;  %v2437_v17 = vpack.c.bf16 %v1579_v0, %v1578_v58  ;;  %v1549_v31 = vld [vmem:[#allocation5 + $0x98] sm:$0xff]  ;;  %v1580_v32 = vld [vmem:[#allocation5 + $0x190] sm:$0xff]  ;;  %v487_v23 = vmax.f32 %v394_v60, 0.0  ;;  %v3046_v38 = vpop.f32.mrb[31].mxu1  ;;  %v1582_v60 = vld [vmem:[#allocation5 + $0x1a0] sm:$0xff] }
 0x146   :  { %v541_v59 = vmax.f32 %v317_v52, 0.0  ;;  %2272 = vmatpush1.bf16.msra.mxu0 %v2271_v16  ;;  %2400 = vmatpush1.bf16.msra.mxu1 %v2399_v21  ;;  %v2405_v16 = vpack.c.bf16 %v1547_v54, %v1546_v48  ;;  %v1563_v21 = vld [vmem:[#allocation5 + $0x108] sm:$0xff]  ;;  %v1532_v52 = vld [vmem:[#allocation5 + $0x10] sm:$0xff]  ;;  %v1533_v48 = vld [vmem:[#allocation5 + $0x18] sm:$0xff]  ;;  %v2409_v54 = vpack.c.bf16 %v1549_v31, %v1548_v24  ;;  %v2441_v58 = vpack.c.bf16 %v1581_v36, %v1580_v32 }
 0x147   :  { %2274 = vmatprep.subr.bf16.mxu0 %v2273_v22  ;;  %2402 = vmatprep.subr.bf16.mxu1 %v2401_v42  ;;  %v400_v22 = vadd.f32 %v2950_v12, %v3018_v1  ;;  %v392_v42 = vadd.f32 %v2942_v43, %v3026_v19  ;;  %v2439_v46 = vpack.c.bf16 %v1563_v21, %v1562_v18  ;;  %v1564_v0 = vld [vmem:[#allocation5 + $0x110] sm:$0xff]  ;;  %v1551_v12 = vld [vmem:[#allocation5 + $0xa8] sm:$0xff]  ;;  %v1566_v24 = vld [vmem:[#allocation5 + $0x120] sm:$0xff] }
 0x148   :  { %976 = vmatprep.mubr.f32.mxu0 %v541_v59  ;;  %1298 = vmatprep.mubr.f32.mxu1 %v541_v59  ;;  %v1565_v59 = vld [vmem:[#allocation5 + $0x118] sm:$0xff]  ;;  %v406_v43 = vadd.f32 %v2956_v34, %v3018_v1  ;;  %v2411_v10 = vpack.c.bf16 %v1533_v48, %v1532_v52  ;;  %v1567_v31 = vld [vmem:[#allocation5 + $0x128] sm:$0xff]  ;;  %v1552_v32 = vld [vmem:[#allocation5 + $0xb0] sm:$0xff] }
 0x149   :  { %977 = vmatmul.mubr.f32.gmra.mrb[62].mxu0 %v540_v55  ;;  %1299 = vmatmul.mubr.f32.gmra.mrb[62].mxu1 %v540_v55  ;;  %v491_v55 = vmax.f32 %v400_v22, 0.0  ;;  %v486_v6 = vmax.f32 %v392_v42, 0.0  ;;  %v2443_v14 = vpack.c.bf16 %v1565_v59, %v1564_v0  ;;  %v1553_v34 = vld [vmem:[#allocation5 + $0xb8] sm:$0xff]  ;;  %v1584_v36 = vld [vmem:[#allocation5 + $0x1b0] sm:$0xff]  ;;  %v404_v42 = vadd.f32 %v2954_v26, %v3026_v19 }
 0x14a   :  { %2276 = vmatpush1.bf16.msra.mxu0 %v2275_v30  ;;  %2404 = vmatpush1.bf16.msra.mxu1 %v2403_v2  ;;  %v1550_v30 = vld [vmem:[#allocation5 + $0xa0] sm:$0xff]  ;;  %v1583_v2 = vld [vmem:[#allocation5 + $0x1a8] sm:$0xff]  ;;  %v495_v22 = vmax.f32 %v406_v43, 0.0  ;;  %v1536_v52 = vld [vmem:[#allocation5 + $0x30] sm:$0xff]  ;;  %v418_v26 = vadd.f32 %v2968_v20, %v3018_v1  ;;  %v410_v43 = vadd.f32 %v2960_v47, %v3026_v19  ;;  %v424_v47 = vadd.f32 %v2974_v44, %v3018_v1 }
 0x14b   :  { %1047 = vmatprep.mubr.f32.mxu0 %v483_v9  ;;  %1369 = vmatprep.mubr.f32.mxu1 %v483_v9  ;;  %v398_v9 = vadd.f32 %v2948_v5, %v3026_v19  ;;  %v2413_v18 = vpack.c.bf16 %v1551_v12, %v1550_v30  ;;  %v2445_v21 = vpack.c.bf16 %v1583_v2, %v1582_v60  ;;  %v1537_v48 = vld [vmem:[#allocation5 + $0x38] sm:$0xff]  ;;  %v1568_v0 = vld [vmem:[#allocation5 + $0x130] sm:$0xff]  ;;  %v1554_v30 = vld [vmem:[#allocation5 + $0xc0] sm:$0xff] }
 0x14c   :  { %2406 = vmatprep.subr.bf16.mxu0 %v2405_v16  ;;  %2438 = vmatprep.subr.bf16.mxu1 %v2437_v17  ;;  %v1534_v16 = vld [vmem:[#allocation5 + $0x20] sm:$0xff]  ;;  %v1535_v17 = vld [vmem:[#allocation5 + $0x28] sm:$0xff]  ;;  %v412_v5 = vadd.f32 %v2962_v61, %v3018_v1  ;;  %v1569_v59 = vld [vmem:[#allocation5 + $0x138] sm:$0xff] }
 0x14d   :  { %1048 = vmatmul.mubr.f32.vlgmr.msra.gmra.mrb[32].mxu0 %v482_v41  ;;  %1370 = vmatmul.mubr.f32.vlgmr.msra.gmra.mrb[32].mxu1 %v482_v41  ;;  %v490_v41 = vmax.f32 %v398_v9, 0.0  ;;  %v1555_v61 = vld [vmem:[#allocation5 + $0xc8] sm:$0xff]  ;;  %v1586_v12 = vld [vmem:[#allocation5 + $0x1c0] sm:$0xff]  ;;  %v2451_v9 = vpack.c.bf16 %v1569_v59, %v1568_v0  ;;  %v1557_v20 = vld [vmem:[#allocation5 + $0xd8] sm:$0xff]  ;;  %v507_v59 = vmax.f32 %v424_v47, 0.0 }
 0x14e   :  { %1053 = vmatprep.mubr.f32.mxu0 %v487_v23  ;;  %1375 = vmatprep.mubr.f32.mxu1 %v487_v23  ;;  %v1585_v23 = vld [vmem:[#allocation5 + $0x1b8] sm:$0xff]  ;;  %v1587_v60 = vld [vmem:[#allocation5 + $0x1c8] sm:$0xff]  ;;  %v499_v2 = vmax.f32 %v412_v5, 0.0 }
 0x14f   :  { %2408 = vmatpush3.bf16.msra.mxu0 %v2407_v45  ;;  %2440 = vmatpush3.bf16.msra.mxu1 %v2439_v46  ;;  %v2415_v45 = vpack.c.bf16 %v1535_v17, %v1534_v16  ;;  %v2447_v46 = vpack.c.bf16 %v1567_v31, %v1566_v24  ;;  %v2421_v16 = vpack.c.bf16 %v1555_v61, %v1554_v30  ;;  %v1556_v24 = vld [vmem:[#allocation5 + $0xd0] sm:$0xff]  ;;  %v1559_v44 = vld [vmem:[#allocation5 + $0xe8] sm:$0xff] }
 0x150   :  { %2410 = vmatprep.subr.bf16.mxu0 %v2409_v54  ;;  %2442 = vmatprep.subr.bf16.mxu1 %v2441_v58  ;;  %v2417_v54 = vpack.c.bf16 %v1553_v34, %v1552_v32  ;;  %v2449_v58 = vpack.c.bf16 %v1585_v23, %v1584_v36  ;;  %v2453_v17 = vpack.c.bf16 %v1587_v60, %v1586_v12  ;;  %v1588_v31 = vld [vmem:[#allocation5 + $0x1d0] sm:$0xff]  ;;  %v1589_v32 = vld [vmem:[#allocation5 + $0x1d8] sm:$0xff]  ;;  %v503_v34 = vmax.f32 %v418_v26, 0.0  ;;  %v1591_v0 = vld [vmem:[#allocation5 + $0x1e8] sm:$0xff] }
 0x151   :  { %1054 = vmatmul.mubr.f32.gmra.mrb[34].mxu0 %v486_v6  ;;  %1376 = vmatmul.mubr.f32.gmra.mrb[34].mxu1 %v486_v6  ;;  %v2419_v6 = vpack.c.bf16 %v1537_v48, %v1536_v52  ;;  %v498_v36 = vmax.f32 %v410_v43, 0.0  ;;  %v416_v23 = vadd.f32 %v2966_v13, %v3026_v19  ;;  %v1572_v52 = vld [vmem:[#allocation5 + $0x150] sm:$0xff]  ;;  %v1573_v48 = vld [vmem:[#allocation5 + $0x158] sm:$0xff]  ;;  %v430_v13 = vadd.f32 %v2980_v11, %v3018_v1 }
 0x152   :  { %1059 = vmatprep.mubr.f32.mxu0 %v491_v55  ;;  %1381 = vmatprep.mubr.f32.mxu1 %v491_v55  ;;  %v494_v55 = vmax.f32 %v404_v42, 0.0  ;;  %v1541_v42 = vld [vmem:[#allocation5 + $0x58] sm:$0xff]  ;;  %v422_v61 = vadd.f32 %v2972_v37, %v3026_v19  ;;  %v2459_v60 = vpack.c.bf16 %v1573_v48, %v1572_v52  ;;  %v436_v37 = vadd.f32 %v2986_v39, %v3018_v1 }
 0x153   :  { %2412 = vmatpush3.bf16.msra.mxu0 %v2411_v10  ;;  %2444 = vmatpush3.bf16.msra.mxu1 %v2443_v14  ;;  %v1538_v10 = vld [vmem:[#allocation5 + $0x40] sm:$0xff]  ;;  %v1539_v14 = vld [vmem:[#allocation5 + $0x48] sm:$0xff]  ;;  %v502_v30 = vmax.f32 %v416_v23, 0.0  ;;  %v1561_v11 = vld [vmem:[#allocation5 + $0xf8] sm:$0xff]  ;;  %v442_v39 = vadd.f32 %v2992_v8, %v3018_v1  ;;  %v448_v23 = vadd.f32 %v2998_v40, %v3018_v1  ;;  %v440_v8 = vadd.f32 %v2990_v62, %v3026_v19 }
 0x154   :  { %2414 = vmatprep.subr.bf16.mxu0 %v2413_v18  ;;  %2446 = vmatprep.subr.bf16.mxu1 %v2445_v21  ;;  %v1570_v18 = vld [vmem:[#allocation5 + $0x140] sm:$0xff]  ;;  %v1571_v21 = vld [vmem:[#allocation5 + $0x148] sm:$0xff]  ;;  %v460_v62 = vadd.f32 %v3012_v56, %v3018_v1  ;;  %v458_v48 = vadd.f32 %v3010_v35, %v3026_v19  ;;  %v478_v35 = vadd.f32 %v3046_v38, %v3018_v1  ;;  %v1593_v38 = vld [vmem:[#allocation5 + $0x1f8] sm:$0xff] }
 0x155   :  { %1060 = vmatmul.mubr.f32.gmra.mrb[36].mxu0 %v490_v41  ;;  %1382 = vmatmul.mubr.f32.gmra.mrb[36].mxu1 %v490_v41  ;;  %v2455_v5 = vpack.c.bf16 %v1571_v21, %v1570_v18  ;;  %v1540_v41 = vld [vmem:[#allocation5 + $0x50] sm:$0xff] }
 0x156   :  { %1065 = vmatprep.mubr.f32.mxu0 %v495_v22  ;;  %1387 = vmatprep.mubr.f32.mxu1 %v495_v22  ;;  %v2423_v22 = vpack.c.bf16 %v1539_v14, %v1538_v10  ;;  %v2427_v12 = vpack.c.bf16 %v1541_v42, %v1540_v41  ;;  %v1560_v10 = vld [vmem:[#allocation5 + $0xf0] sm:$0xff]  ;;  %v511_v14 = vmax.f32 %v430_v13, 0.0  ;;  %v518_v41 = vmax.f32 %v440_v8, 0.0 }
 0x157   :  { %2416 = vmatpush3.bf16.msra.mxu0 %v2415_v45  ;;  %2448 = vmatpush3.bf16.msra.mxu1 %v2447_v46  ;;  %v2425_v45 = vpack.c.bf16 %v1557_v20, %v1556_v24  ;;  %v2457_v46 = vpack.c.bf16 %v1589_v32, %v1588_v31  ;;  %v2433_v24 = vpack.c.bf16 %v1561_v11, %v1560_v10  ;;  %v1544_v20 = vld [vmem:[#allocation5 + $0x70] sm:$0xff]  ;;  %v1545_v31 = vld [vmem:[#allocation5 + $0x78] sm:$0xff]  ;;  %v515_v32 = vmax.f32 %v436_v37, 0.0 }
 0x158   :  { %2418 = vmatprep.subr.bf16.mxu0 %v2417_v54  ;;  %2450 = vmatprep.subr.bf16.mxu1 %v2449_v58  ;;  %v1558_v54 = vld [vmem:[#allocation5 + $0xe0] sm:$0xff]  ;;  %v2435_v47 = vpack.c.bf16 %v1545_v31, %v1544_v20  ;;  %v446_v42 = vadd.f32 %v2996_v27, %v3026_v19  ;;  %v531_v52 = vmax.f32 %v460_v62, 0.0  ;;  %v466_v27 = vadd.f32 %v3028_v28, %v3018_v1 }
 0x159   :  { %1066 = vmatmul.mubr.f32.gmra.mrb[38].mxu0 %v494_v55  ;;  %1388 = vmatmul.mubr.f32.gmra.mrb[38].mxu1 %v494_v55  ;;  %v1590_v58 = vld [vmem:[#allocation5 + $0x1e0] sm:$0xff]  ;;  %v2429_v26 = vpack.c.bf16 %v1559_v44, %v1558_v54  ;;  %v1543_v55 = vld [vmem:[#allocation5 + $0x68] sm:$0xff]  ;;  %v530_v56 = vmax.f32 %v458_v48, 0.0  ;;  %v464_v44 = vadd.f32 %v3021_v7, %v3026_v19  ;;  %v476_v7 = vadd.f32 %v3042_v49, %v3026_v19 }
 0x15a   :  { %1071 = vmatprep.mubr.f32.mxu0 %v499_v2  ;;  %1393 = vmatprep.mubr.f32.mxu1 %v499_v2  ;;  %v1542_v2 = vld [vmem:[#allocation5 + $0x60] sm:$0xff]  ;;  %v2461_v43 = vpack.c.bf16 %v1591_v0, %v1590_v58  ;;  %v535_v54 = vmax.f32 %v466_v27, 0.0  ;;  %v470_v0 = vadd.f32 %v3034_v57, %v3026_v19  ;;  %v1576_v57 = vld [vmem:[#allocation5 + $0x170] sm:$0xff] }
 0x15b   :  { %2420 = vmatpush3.bf16.msra.mxu0 %v2419_v6  ;;  %2452 = vmatpush3.bf16.msra.mxu1 %v2451_v9  ;;  %v1574_v6 = vld [vmem:[#allocation5 + $0x160] sm:$0xff]  ;;  %v1575_v9 = vld [vmem:[#allocation5 + $0x168] sm:$0xff]  ;;  %v2431_v18 = vpack.c.bf16 %v1543_v55, %v1542_v2  ;;  %v534_v28 = vmax.f32 %v464_v44, 0.0  ;;  %v542_v13 = vmax.f32 %v476_v7, 0.0 }
 0x15c   :  { %2422 = vmatprep.subr.bf16.mxu0 %v2421_v16  ;;  %2454 = vmatprep.subr.bf16.mxu1 %v2453_v17  ;;  %v506_v16 = vmax.f32 %v422_v61, 0.0  ;;  %v428_v17 = vadd.f32 %v2978_v3, %v3026_v19  ;;  %v2463_v21 = vpack.c.bf16 %v1575_v9, %v1574_v6  ;;  %v434_v3 = vadd.f32 %v2984_v29, %v3026_v19  ;;  %v1577_v61 = vld [vmem:[#allocation5 + $0x178] sm:$0xff] }
 0x15d   :  { %1072 = vmatmul.mubr.f32.gmra.mrb[40].mxu0 %v498_v36  ;;  %1394 = vmatmul.mubr.f32.gmra.mrb[40].mxu1 %v498_v36  ;;  %v519_v36 = vmax.f32 %v442_v39, 0.0  ;;  %v523_v29 = vmax.f32 %v448_v23, 0.0 }
 0x15e   :  { %1077 = vmatprep.mubr.f32.mxu0 %v503_v34  ;;  %1399 = vmatprep.mubr.f32.mxu1 %v503_v34  ;;  %v510_v34 = vmax.f32 %v428_v17, 0.0 }
 0x15f   :  { %2424 = vmatpush3.bf16.msra.mxu0 %v2423_v22  ;;  %2456 = vmatpush3.bf16.msra.mxu1 %v2455_v5  ;;  %v514_v22 = vmax.f32 %v434_v3, 0.0  ;;  %v454_v5 = vadd.f32 %v3004_v15, %v3018_v1 }
 0x160   :  { %2426 = vmatprep.subr.bf16.mxu0 %v2425_v45  ;;  %2458 = vmatprep.subr.bf16.mxu1 %v2457_v46  ;;  %v522_v45 = vmax.f32 %v446_v42, 0.0  ;;  %v452_v46 = vadd.f32 %v3002_v63, %v3026_v19  ;;  %v472_v63 = vadd.f32 %v3038_v4, %v3018_v1  ;;  %v538_v4 = vmax.f32 %v470_v0, 0.0  ;;  %v1592_v1 = vld [vmem:[#allocation5 + $0x1f0] sm:$0xff] }
 0x161   :  { %1078 = vmatmul.mubr.f32.gmra.mrb[42].mxu0 %v502_v30  ;;  %1400 = vmatmul.mubr.f32.gmra.mrb[42].mxu1 %v502_v30  ;;  %v527_v40 = vmax.f32 %v454_v5, 0.0  ;;  %v2465_v30 = vpack.c.bf16 %v1593_v38, %v1592_v1 }
 0x162   :  { %1083 = vmatprep.mubr.f32.mxu0 %v507_v59  ;;  %1405 = vmatprep.mubr.f32.mxu1 %v507_v59  ;;  %v526_v15 = vmax.f32 %v452_v46, 0.0  ;;  %v539_v58 = vmax.f32 %v472_v63, 0.0  ;;  %v543_v59 = vmax.f32 %v478_v35, 0.0 }
 0x163   :  { %2428 = vmatpush3.bf16.msra.mxu0 %v2427_v12  ;;  %2460 = vmatpush3.bf16.msra.mxu1 %v2459_v60  ;;  %v2467_v12 = vpack.c.bf16 %v1577_v61, %v1576_v57  ;;  %v800_v60 = vld [vmem:[%s3224_s4] sm:$0xf] }
 0x164   :  { %2430 = vmatprep.subr.bf16.mxu0 %v2429_v26  ;;  %2462 = vmatprep.subr.bf16.mxu1 %v2461_v43  ;;  %v3109_v19 = vrot.slane %v800_v60, %v91_v51  ;;  %v3113_v49 = vrot.slane %v800_v60, %v99_v33  ;;  %v3117_v2 = vrot.slane %v800_v60, %v95_v53 }
 0x165   :  { %1084 = vmatmul.mubr.f32.gmra.mrb[44].mxu0 %v506_v16  ;;  %1406 = vmatmul.mubr.f32.gmra.mrb[44].mxu1 %v506_v16  ;;  %v3121_v26 = vrot.slane %v800_v60, %v103_v25 }
 0x166   :  { %1089 = vmatprep.mubr.f32.mxu0 %v511_v14  ;;  %1411 = vmatprep.mubr.f32.mxu1 %v511_v14 }
 0x167   :  { %2432 = vmatpush3.bf16.msra.mxu0 %v2431_v18  ;;  %2464 = vmatpush3.bf16.msra.mxu1 %v2463_v21 }
 0x168   :  { %2434 = vmatprep.subr.bf16.mxu0 %v2433_v24  ;;  %2466 = vmatprep.subr.bf16.mxu1 %v2465_v30 }
 0x169   :  { %1090 = vmatmul.mubr.f32.gmra.mrb[46].mxu0 %v510_v34  ;;  %1412 = vmatmul.mubr.f32.gmra.mrb[46].mxu1 %v510_v34 }
 0x16a   :  { %1095 = vmatprep.mubr.f32.mxu0 %v515_v32  ;;  %1417 = vmatprep.mubr.f32.mxu1 %v515_v32 }
 0x16b   :  { %2436 = vmatpush3.bf16.msra.mxu0 %v2435_v47  ;;  %2468 = vmatpush3.bf16.msra.mxu1 %v2467_v12 }
 0x16d   :  { %1096 = vmatmul.mubr.f32.gmra.mrb[48].mxu0 %v514_v22  ;;  %1418 = vmatmul.mubr.f32.gmra.mrb[48].mxu1 %v514_v22 }
 0x16e   :  { %1101 = vmatprep.mubr.f32.mxu0 %v519_v36  ;;  %1423 = vmatprep.mubr.f32.mxu1 %v519_v36 }
 0x171   :  { %1102 = vmatmul.mubr.f32.gmra.mrb[50].mxu0 %v518_v41  ;;  %1424 = vmatmul.mubr.f32.gmra.mrb[50].mxu1 %v518_v41 }
 0x172   :  { %1107 = vmatprep.mubr.f32.mxu0 %v523_v29  ;;  %1429 = vmatprep.mubr.f32.mxu1 %v523_v29 }
 0x175   :  { %1108 = vmatmul.mubr.f32.gmra.mrb[52].mxu0 %v522_v45  ;;  %1430 = vmatmul.mubr.f32.gmra.mrb[52].mxu1 %v522_v45 }
 0x176   :  { %1113 = vmatprep.mubr.f32.mxu0 %v527_v40  ;;  %1435 = vmatprep.mubr.f32.mxu1 %v527_v40 }
 0x179   :  { %1114 = vmatmul.mubr.f32.gmra.mrb[54].mxu0 %v526_v15  ;;  %1436 = vmatmul.mubr.f32.gmra.mrb[54].mxu1 %v526_v15 }
 0x17a   :  { %1119 = vmatprep.mubr.f32.mxu0 %v531_v52  ;;  %1441 = vmatprep.mubr.f32.mxu1 %v531_v52 }
 0x17d   :  { %1120 = vmatmul.mubr.f32.gmra.mrb[56].mxu0 %v530_v56  ;;  %1442 = vmatmul.mubr.f32.gmra.mrb[56].mxu1 %v530_v56 }
 0x17e   :  { %1125 = vmatprep.mubr.f32.mxu0 %v535_v54  ;;  %1447 = vmatprep.mubr.f32.mxu1 %v535_v54 }
 0x181   :  { %1126 = vmatmul.mubr.f32.gmra.mrb[58].mxu0 %v534_v28  ;;  %1448 = vmatmul.mubr.f32.gmra.mrb[58].mxu1 %v534_v28 }
 0x182   :  { %1131 = vmatprep.mubr.f32.mxu0 %v539_v58  ;;  %1453 = vmatprep.mubr.f32.mxu1 %v539_v58 }
 0x185   :  { %1132 = vmatmul.mubr.f32.gmra.mrb[60].mxu0 %v538_v4  ;;  %1454 = vmatmul.mubr.f32.gmra.mrb[60].mxu1 %v538_v4 }
 0x186   :  { %1137 = vmatprep.mubr.f32.mxu0 %v543_v59  ;;  %1459 = vmatprep.mubr.f32.mxu1 %v543_v59 }
 0x189   :  { %1138 = vmatmul.mubr.f32.gmra.mrb[62].mxu0 %v542_v13  ;;  %1460 = vmatmul.mubr.f32.gmra.mrb[62].mxu1 %v542_v13 }
 0x220   :  { %v1049_v55 = vpop.f32.mrb[32].mxu0  ;;  %v1371_v43 = vpop.f32.mrb[32].mxu1 }
 0x221   :  { %v2469_v6 = vadd.f32 %v1049_v55, %v3109_v19  ;;  %v2501_v9 = vadd.f32 %v1371_v43, %v3113_v49  ;;  %v1051_v51 = vpop.f32.mrb[33].mxu0  ;;  %v1373_v10 = vpop.f32.mrb[33].mxu1 }
 0x222   :  { %v2470_v11 = vadd.f32 %v1051_v51, %v3117_v2  ;;  %v2502_v33 = vadd.f32 %v1373_v10, %v3121_v26 }
 0x223   :  { %v1466_v17 = vmax.f32 %v2469_v6, 0.0  ;;  %v1468_v50 = vmax.f32 %v2501_v9, 0.0 }
 0x224   :  { %v1467_v14 = vmax.f32 %v2470_v11, 0.0  ;;  %v1469_v37 = vmax.f32 %v2502_v33, 0.0  ;;  %v1055_v53 = vpop.f32.mrb[34].mxu0  ;;  %v1377_v16 = vpop.f32.mrb[34].mxu1 }
 0x225   :  { %v2471_v25 = vadd.f32 %v1055_v53, %v3109_v19  ;;  %v2503_v18 = vadd.f32 %v1377_v16, %v3113_v49  ;;  %v1057_v21 = vpop.f32.mrb[35].mxu0  ;;  %v1379_v24 = vpop.f32.mrb[35].mxu1 }
 0x226   :  { %v2472_v20 = vadd.f32 %v1057_v21, %v3117_v2  ;;  %v2504_v31 = vadd.f32 %v1379_v24, %v3121_v26  ;;  %1665 = vmatprep.mubr.f32.mxu0 %v1467_v14  ;;  %1810 = vmatprep.mubr.f32.mxu1 %v1469_v37 }
 0x227   :  { %1666 = vmatmul.mubr.f32.vlgmr.msra.gmra.mrb[64].mxu0 %v1466_v17  ;;  %1811 = vmatmul.mubr.f32.vlgmr.msra.gmra.mrb[64].mxu1 %v1468_v50  ;;  %v1470_v47 = vmax.f32 %v2471_v25, 0.0  ;;  %v1472_v36 = vmax.f32 %v2503_v18, 0.0 }
 0x228   :  { %v1471_v32 = vmax.f32 %v2472_v20, 0.0  ;;  %v1473_v39 = vmax.f32 %v2504_v31, 0.0  ;;  %v1061_v34 = vpop.f32.mrb[36].mxu0  ;;  %v1383_v3 = vpop.f32.mrb[36].mxu1 }
 0x229   :  { %v2473_v23 = vadd.f32 %v1061_v34, %v3109_v19  ;;  %v2505_v22 = vadd.f32 %v1383_v3, %v3113_v49  ;;  %v1063_v8 = vpop.f32.mrb[37].mxu0  ;;  %v1385_v29 = vpop.f32.mrb[37].mxu1 }
 0x22a   :  { %v2474_v5 = vadd.f32 %v1063_v8, %v3117_v2  ;;  %v2506_v41 = vadd.f32 %v1385_v29, %v3121_v26  ;;  %1670 = vmatprep.mubr.f32.mxu0 %v1471_v32  ;;  %1815 = vmatprep.mubr.f32.mxu1 %v1473_v39 }
 0x22b   :  { %1671 = vmatmul.mubr.f32.gmra.mrb[66].mxu0 %v1470_v47  ;;  %1816 = vmatmul.mubr.f32.gmra.mrb[66].mxu1 %v1472_v36  ;;  %v1474_v46 = vmax.f32 %v2473_v23, 0.0  ;;  %v1476_v52 = vmax.f32 %v2505_v22, 0.0 }
 0x22c   :  { %v1475_v42 = vmax.f32 %v2474_v5, 0.0  ;;  %v1477_v40 = vmax.f32 %v2506_v41, 0.0  ;;  %v1067_v62 = vpop.f32.mrb[38].mxu0  ;;  %v1389_v45 = vpop.f32.mrb[38].mxu1 }
 0x22d   :  { %v2475_v27 = vadd.f32 %v1067_v62, %v3109_v19  ;;  %v2507_v15 = vadd.f32 %v1389_v45, %v3113_v49  ;;  %v1069_v48 = vpop.f32.mrb[39].mxu0  ;;  %v1391_v54 = vpop.f32.mrb[39].mxu1 }
 0x22e   :  { %v2476_v63 = vadd.f32 %v1069_v48, %v3117_v2  ;;  %v2508_v56 = vadd.f32 %v1391_v54, %v3121_v26  ;;  %1675 = vmatprep.mubr.f32.mxu0 %v1475_v42  ;;  %1820 = vmatprep.mubr.f32.mxu1 %v1477_v40 }
 0x22f   :  { %1676 = vmatmul.mubr.f32.gmra.mrb[68].mxu0 %v1474_v46  ;;  %1821 = vmatmul.mubr.f32.gmra.mrb[68].mxu1 %v1476_v52  ;;  %v1478_v0 = vmax.f32 %v2475_v27, 0.0  ;;  %v1480_v59 = vmax.f32 %v2507_v15, 0.0 }
 0x230   :  { %v1479_v44 = vmax.f32 %v2476_v63, 0.0  ;;  %v1481_v58 = vmax.f32 %v2508_v56, 0.0  ;;  %v1073_v35 = vpop.f32.mrb[40].mxu0  ;;  %v1395_v28 = vpop.f32.mrb[40].mxu1 }
 0x231   :  { %v2477_v4 = vadd.f32 %v1073_v35, %v3109_v19  ;;  %v2509_v7 = vadd.f32 %v1395_v28, %v3113_v49  ;;  %v1075_v13 = vpop.f32.mrb[41].mxu0  ;;  %v1397_v1 = vpop.f32.mrb[41].mxu1 }
 0x232   :  { %v2478_v38 = vadd.f32 %v1075_v13, %v3117_v2  ;;  %v2510_v30 = vadd.f32 %v1397_v1, %v3121_v26  ;;  %1680 = vmatprep.mubr.f32.mxu0 %v1479_v44  ;;  %1825 = vmatprep.mubr.f32.mxu1 %v1481_v58 }
 0x233   :  { %1681 = vmatmul.mubr.f32.gmra.mrb[70].mxu0 %v1478_v0  ;;  %1826 = vmatmul.mubr.f32.gmra.mrb[70].mxu1 %v1480_v59  ;;  %v1482_v55 = vmax.f32 %v2477_v4, 0.0  ;;  %v1484_v43 = vmax.f32 %v2509_v7, 0.0 }
 0x234   :  { %v1483_v57 = vmax.f32 %v2478_v38, 0.0  ;;  %v1485_v61 = vmax.f32 %v2510_v30, 0.0  ;;  %v1079_v12 = vpop.f32.mrb[42].mxu0  ;;  %v1401_v60 = vpop.f32.mrb[42].mxu1 }
 0x235   :  { %v2479_v6 = vadd.f32 %v1079_v12, %v3109_v19  ;;  %v2511_v9 = vadd.f32 %v1401_v60, %v3113_v49  ;;  %v1081_v51 = vpop.f32.mrb[43].mxu0  ;;  %v1403_v10 = vpop.f32.mrb[43].mxu1 }
 0x236   :  { %v2480_v11 = vadd.f32 %v1081_v51, %v3117_v2  ;;  %v2512_v33 = vadd.f32 %v1403_v10, %v3121_v26  ;;  %1685 = vmatprep.mubr.f32.mxu0 %v1483_v57  ;;  %1830 = vmatprep.mubr.f32.mxu1 %v1485_v61 }
 0x237   :  { %1686 = vmatmul.mubr.f32.gmra.mrb[72].mxu0 %v1482_v55  ;;  %1831 = vmatmul.mubr.f32.gmra.mrb[72].mxu1 %v1484_v43  ;;  %v1486_v17 = vmax.f32 %v2479_v6, 0.0  ;;  %v1488_v50 = vmax.f32 %v2511_v9, 0.0 }
 0x238   :  { %v1487_v14 = vmax.f32 %v2480_v11, 0.0  ;;  %v1489_v37 = vmax.f32 %v2512_v33, 0.0  ;;  %v1085_v53 = vpop.f32.mrb[44].mxu0  ;;  %v1407_v16 = vpop.f32.mrb[44].mxu1 }
 0x239   :  { %v2481_v25 = vadd.f32 %v1085_v53, %v3109_v19  ;;  %v2513_v18 = vadd.f32 %v1407_v16, %v3113_v49  ;;  %v1087_v21 = vpop.f32.mrb[45].mxu0  ;;  %v1409_v24 = vpop.f32.mrb[45].mxu1 }
 0x23a   :  { %v2482_v20 = vadd.f32 %v1087_v21, %v3117_v2  ;;  %v2514_v31 = vadd.f32 %v1409_v24, %v3121_v26  ;;  %1690 = vmatprep.mubr.f32.mxu0 %v1487_v14  ;;  %1835 = vmatprep.mubr.f32.mxu1 %v1489_v37 }
 0x23b   :  { %1691 = vmatmul.mubr.f32.gmra.mrb[74].mxu0 %v1486_v17  ;;  %1836 = vmatmul.mubr.f32.gmra.mrb[74].mxu1 %v1488_v50  ;;  %v1490_v47 = vmax.f32 %v2481_v25, 0.0  ;;  %v1492_v36 = vmax.f32 %v2513_v18, 0.0 }
 0x23c   :  { %v1491_v32 = vmax.f32 %v2482_v20, 0.0  ;;  %v1493_v39 = vmax.f32 %v2514_v31, 0.0  ;;  %v1091_v34 = vpop.f32.mrb[46].mxu0  ;;  %v1413_v3 = vpop.f32.mrb[46].mxu1 }
 0x23d   :  { %v2483_v23 = vadd.f32 %v1091_v34, %v3109_v19  ;;  %v2515_v22 = vadd.f32 %v1413_v3, %v3113_v49  ;;  %v1093_v8 = vpop.f32.mrb[47].mxu0  ;;  %v1415_v29 = vpop.f32.mrb[47].mxu1 }
 0x23e   :  { %v2484_v5 = vadd.f32 %v1093_v8, %v3117_v2  ;;  %v2516_v41 = vadd.f32 %v1415_v29, %v3121_v26  ;;  %1695 = vmatprep.mubr.f32.mxu0 %v1491_v32  ;;  %1840 = vmatprep.mubr.f32.mxu1 %v1493_v39 }
 0x23f   :  { %1696 = vmatmul.mubr.f32.gmra.mrb[76].mxu0 %v1490_v47  ;;  %1841 = vmatmul.mubr.f32.gmra.mrb[76].mxu1 %v1492_v36  ;;  %v1494_v46 = vmax.f32 %v2483_v23, 0.0  ;;  %v1496_v52 = vmax.f32 %v2515_v22, 0.0 }
 0x240   :  { %v1495_v42 = vmax.f32 %v2484_v5, 0.0  ;;  %v1497_v40 = vmax.f32 %v2516_v41, 0.0  ;;  %v1097_v62 = vpop.f32.mrb[48].mxu0  ;;  %v1419_v45 = vpop.f32.mrb[48].mxu1 }
 0x241   :  { %v2485_v27 = vadd.f32 %v1097_v62, %v3109_v19  ;;  %v2517_v15 = vadd.f32 %v1419_v45, %v3113_v49  ;;  %v1099_v48 = vpop.f32.mrb[49].mxu0  ;;  %v1421_v54 = vpop.f32.mrb[49].mxu1 }
 0x242   :  { %v2486_v63 = vadd.f32 %v1099_v48, %v3117_v2  ;;  %v2518_v56 = vadd.f32 %v1421_v54, %v3121_v26  ;;  %1700 = vmatprep.mubr.f32.mxu0 %v1495_v42  ;;  %1845 = vmatprep.mubr.f32.mxu1 %v1497_v40 }
 0x243   :  { %1701 = vmatmul.mubr.f32.gmra.mrb[78].mxu0 %v1494_v46  ;;  %1846 = vmatmul.mubr.f32.gmra.mrb[78].mxu1 %v1496_v52  ;;  %v1498_v0 = vmax.f32 %v2485_v27, 0.0  ;;  %v1500_v59 = vmax.f32 %v2517_v15, 0.0 }
 0x244   :  { %v1499_v44 = vmax.f32 %v2486_v63, 0.0  ;;  %v1501_v58 = vmax.f32 %v2518_v56, 0.0  ;;  %v1103_v35 = vpop.f32.mrb[50].mxu0  ;;  %v1425_v28 = vpop.f32.mrb[50].mxu1 }
 0x245   :  { %v2487_v4 = vadd.f32 %v1103_v35, %v3109_v19  ;;  %v2519_v7 = vadd.f32 %v1425_v28, %v3113_v49  ;;  %v1105_v13 = vpop.f32.mrb[51].mxu0  ;;  %v1427_v1 = vpop.f32.mrb[51].mxu1 }
 0x246   :  { %v2488_v38 = vadd.f32 %v1105_v13, %v3117_v2  ;;  %v2520_v30 = vadd.f32 %v1427_v1, %v3121_v26  ;;  %1705 = vmatprep.mubr.f32.mxu0 %v1499_v44  ;;  %1850 = vmatprep.mubr.f32.mxu1 %v1501_v58 }
 0x247   :  { %1706 = vmatmul.mubr.f32.gmra.mrb[80].mxu0 %v1498_v0  ;;  %1851 = vmatmul.mubr.f32.gmra.mrb[80].mxu1 %v1500_v59  ;;  %v1502_v55 = vmax.f32 %v2487_v4, 0.0  ;;  %v1504_v43 = vmax.f32 %v2519_v7, 0.0 }
 0x248   :  { %v1503_v57 = vmax.f32 %v2488_v38, 0.0  ;;  %v1505_v61 = vmax.f32 %v2520_v30, 0.0  ;;  %v1109_v12 = vpop.f32.mrb[52].mxu0  ;;  %v1431_v60 = vpop.f32.mrb[52].mxu1 }
 0x249   :  { %v2489_v6 = vadd.f32 %v1109_v12, %v3109_v19  ;;  %v2521_v9 = vadd.f32 %v1431_v60, %v3113_v49  ;;  %v1111_v51 = vpop.f32.mrb[53].mxu0  ;;  %v1433_v10 = vpop.f32.mrb[53].mxu1 }
 0x24a   :  { %v2490_v11 = vadd.f32 %v1111_v51, %v3117_v2  ;;  %v2522_v33 = vadd.f32 %v1433_v10, %v3121_v26  ;;  %1710 = vmatprep.mubr.f32.mxu0 %v1503_v57  ;;  %1855 = vmatprep.mubr.f32.mxu1 %v1505_v61 }
 0x24b   :  { %1711 = vmatmul.mubr.f32.gmra.mrb[82].mxu0 %v1502_v55  ;;  %1856 = vmatmul.mubr.f32.gmra.mrb[82].mxu1 %v1504_v43  ;;  %v1506_v17 = vmax.f32 %v2489_v6, 0.0  ;;  %v1508_v50 = vmax.f32 %v2521_v9, 0.0 }
 0x24c   :  { %v1507_v14 = vmax.f32 %v2490_v11, 0.0  ;;  %v1509_v37 = vmax.f32 %v2522_v33, 0.0  ;;  %v1115_v53 = vpop.f32.mrb[54].mxu0  ;;  %v1437_v16 = vpop.f32.mrb[54].mxu1 }
 0x24d   :  { %v2491_v25 = vadd.f32 %v1115_v53, %v3109_v19  ;;  %v2523_v18 = vadd.f32 %v1437_v16, %v3113_v49  ;;  %v1117_v21 = vpop.f32.mrb[55].mxu0  ;;  %v1439_v24 = vpop.f32.mrb[55].mxu1 }
 0x24e   :  { %v2492_v20 = vadd.f32 %v1117_v21, %v3117_v2  ;;  %v2524_v31 = vadd.f32 %v1439_v24, %v3121_v26  ;;  %1715 = vmatprep.mubr.f32.mxu0 %v1507_v14  ;;  %1860 = vmatprep.mubr.f32.mxu1 %v1509_v37 }
 0x24f   :  { %1716 = vmatmul.mubr.f32.gmra.mrb[84].mxu0 %v1506_v17  ;;  %1861 = vmatmul.mubr.f32.gmra.mrb[84].mxu1 %v1508_v50  ;;  %v1510_v47 = vmax.f32 %v2491_v25, 0.0  ;;  %v1512_v36 = vmax.f32 %v2523_v18, 0.0 }
 0x250   :  { %v1511_v32 = vmax.f32 %v2492_v20, 0.0  ;;  %v1513_v39 = vmax.f32 %v2524_v31, 0.0  ;;  %v1121_v34 = vpop.f32.mrb[56].mxu0  ;;  %v1443_v3 = vpop.f32.mrb[56].mxu1 }
 0x251   :  { %v2493_v23 = vadd.f32 %v1121_v34, %v3109_v19  ;;  %v2525_v22 = vadd.f32 %v1443_v3, %v3113_v49  ;;  %v1123_v8 = vpop.f32.mrb[57].mxu0  ;;  %v1445_v29 = vpop.f32.mrb[57].mxu1 }
 0x252   :  { %v2494_v5 = vadd.f32 %v1123_v8, %v3117_v2  ;;  %v2526_v41 = vadd.f32 %v1445_v29, %v3121_v26  ;;  %1720 = vmatprep.mubr.f32.mxu0 %v1511_v32  ;;  %1865 = vmatprep.mubr.f32.mxu1 %v1513_v39 }
 0x253   :  { %1721 = vmatmul.mubr.f32.gmra.mrb[86].mxu0 %v1510_v47  ;;  %1866 = vmatmul.mubr.f32.gmra.mrb[86].mxu1 %v1512_v36  ;;  %v1514_v46 = vmax.f32 %v2493_v23, 0.0  ;;  %v1516_v52 = vmax.f32 %v2525_v22, 0.0 }
 0x254   :  { %v1515_v42 = vmax.f32 %v2494_v5, 0.0  ;;  %v1517_v40 = vmax.f32 %v2526_v41, 0.0  ;;  %v1127_v62 = vpop.f32.mrb[58].mxu0  ;;  %v1449_v45 = vpop.f32.mrb[58].mxu1 }
 0x255   :  { %v2495_v27 = vadd.f32 %v1127_v62, %v3109_v19  ;;  %v2527_v15 = vadd.f32 %v1449_v45, %v3113_v49  ;;  %v1129_v48 = vpop.f32.mrb[59].mxu0  ;;  %v1451_v54 = vpop.f32.mrb[59].mxu1 }
 0x256   :  { %v2496_v63 = vadd.f32 %v1129_v48, %v3117_v2  ;;  %v2528_v56 = vadd.f32 %v1451_v54, %v3121_v26  ;;  %1725 = vmatprep.mubr.f32.mxu0 %v1515_v42  ;;  %1870 = vmatprep.mubr.f32.mxu1 %v1517_v40 }
 0x257   :  { %1726 = vmatmul.mubr.f32.gmra.mrb[88].mxu0 %v1514_v46  ;;  %1871 = vmatmul.mubr.f32.gmra.mrb[88].mxu1 %v1516_v52  ;;  %v1518_v0 = vmax.f32 %v2495_v27, 0.0  ;;  %v1520_v59 = vmax.f32 %v2527_v15, 0.0 }
 0x258   :  { %v1519_v44 = vmax.f32 %v2496_v63, 0.0  ;;  %v1521_v58 = vmax.f32 %v2528_v56, 0.0  ;;  %v1133_v35 = vpop.f32.mrb[60].mxu0  ;;  %v1455_v28 = vpop.f32.mrb[60].mxu1 }
 0x259   :  { %v2497_v4 = vadd.f32 %v1133_v35, %v3109_v19  ;;  %v2529_v7 = vadd.f32 %v1455_v28, %v3113_v49  ;;  %v1135_v13 = vpop.f32.mrb[61].mxu0  ;;  %v1457_v1 = vpop.f32.mrb[61].mxu1 }
 0x25a   :  { %v2498_v38 = vadd.f32 %v1135_v13, %v3117_v2  ;;  %v2530_v30 = vadd.f32 %v1457_v1, %v3121_v26  ;;  %1730 = vmatprep.mubr.f32.mxu0 %v1519_v44  ;;  %1875 = vmatprep.mubr.f32.mxu1 %v1521_v58 }
 0x25b   :  { %1731 = vmatmul.mubr.f32.gmra.mrb[90].mxu0 %v1518_v0  ;;  %1876 = vmatmul.mubr.f32.gmra.mrb[90].mxu1 %v1520_v59  ;;  %v1522_v55 = vmax.f32 %v2497_v4, 0.0  ;;  %v1524_v43 = vmax.f32 %v2529_v7, 0.0 }
 0x25c   :  { %v1523_v57 = vmax.f32 %v2498_v38, 0.0  ;;  %v1525_v61 = vmax.f32 %v2530_v30, 0.0  ;;  %v1139_v12 = vpop.f32.mrb[62].mxu0  ;;  %v1461_v60 = vpop.f32.mrb[62].mxu1 }
 0x25d   :  { %v2499_v6 = vadd.f32 %v1139_v12, %v3109_v19  ;;  %v2531_v9 = vadd.f32 %v1461_v60, %v3113_v49  ;;  %v1141_v51 = vpop.f32.mrb[63].mxu0  ;;  %v1463_v10 = vpop.f32.mrb[63].mxu1 }
 0x25e   :  { %v2500_v11 = vadd.f32 %v1141_v51, %v3117_v2  ;;  %v2532_v33 = vadd.f32 %v1463_v10, %v3121_v26  ;;  %1735 = vmatprep.mubr.f32.mxu0 %v1523_v57  ;;  %1880 = vmatprep.mubr.f32.mxu1 %v1525_v61  ;;  %v3190_v2 = vld [vmem:[%s3226_s6] ss:$0 sm:$0xff]  ;;  %s2684_s6 = smov [#allocation7]  }
 0x25f   :  { %1736 = vmatmul.mubr.f32.gmra.mrb[92].mxu0 %v1522_v55  ;;  %1881 = vmatmul.mubr.f32.gmra.mrb[92].mxu1 %v1524_v43  ;;  %v1526_v53 = vmax.f32 %v2499_v6, 0.0  ;;  %v1528_v16 = vmax.f32 %v2531_v9, 0.0  ;;  %s1930_s19 = sshll.u32 %s2684_s6, 4  ;;  %s1931_s19 = int_to_ptr.vmem [resolvable:$true] %s1930_s19 }
 0x260   :  { %v1527_v14 = vmax.f32 %v2500_v11, 0.0  ;;  %v1529_v37 = vmax.f32 %v2532_v33, 0.0  ;;  %s2649_s20 = scalar_lea.vmem %s1931_s19, 128  ;;  %p2654_p3 = scmp.lt.s32.totalorder %s1931_s19, %s1931_s19 }
 0x261   :  { %p2650_p2 = scmp.ne.s32.totalorder %s1931_s19, %s2649_s20  ;;  %p2655_p4 = scmp.lt.s32.totalorder %s2649_s20, %s2649_s20 }
 0x262   :  { %1740 = vmatprep.mubr.f32.mxu0 %v1527_v14  ;;  %1885 = vmatprep.mubr.f32.mxu1 %v1529_v37 }
 0x263   :  { %1741 = vmatmul.mubr.f32.gmra.mrb[94].mxu0 %v1526_v53  ;;  %1886 = vmatmul.mubr.f32.gmra.mrb[94].mxu1 %v1528_v16  ;;  %p2656_p5 = por %p2655_p4, %p2654_p3 }
 0x265   :  { %p2657_p6 = pnand %p2656_p5, %p2650_p2 }
 0x2fa   :  { %v2005_v19 = vpop.f32.mrb[64].mxu0  ;;  %v2085_v49 = vpop.f32.mrb[64].mxu1 }
 0x2fb   :  { %v2006_v17 = vpop.f32.mrb[65].mxu0  ;;  %v2086_v50 = vpop.f32.mrb[65].mxu1 }
 0x2fc   :  { %v2007_v26 = vadd.f32 %v2006_v17, %v2005_v19  ;;  %v2087_v25 = vadd.f32 %v2086_v50, %v2085_v49 }
 0x2fe   :  { %v2008_v18 = vpop.f32.mrb[66].mxu0  ;;  %v2088_v21 = vpop.f32.mrb[66].mxu1  ;;  %v1668_v24 = vadd.f32 %v2007_v26, %v3190_v2 }
 0x2ff   :  { %v2009_v20 = vpop.f32.mrb[67].mxu0  ;;  %v2089_v31 = vpop.f32.mrb[67].mxu1 }
 0x300   :  { %v2010_v32 = vadd.f32 %v2009_v20, %v2008_v18  ;;  %v2090_v39 = vadd.f32 %v2089_v31, %v2088_v21  ;;  %v1813_v34 = vadd.f32 %v2087_v25, %v1668_v24 }
 0x302   :  { %v1673_v3 = vadd.f32 %v2010_v32, %v3190_v2  ;;  %v2011_v47 = vpop.f32.mrb[68].mxu0  ;;  %v2091_v36 = vpop.f32.mrb[68].mxu1  ;;  %1891 = vxpose.xlu0.b32.start [1/16] (narrow) %v1813_v34, 8 }
 0x303   :  { %v2012_v23 = vpop.f32.mrb[69].mxu0  ;;  %v2092_v22 = vpop.f32.mrb[69].mxu1 }
 0x304   :  { %v2013_v8 = vadd.f32 %v2012_v23, %v2011_v47  ;;  %v2093_v29 = vadd.f32 %v2092_v22, %v2091_v36  ;;  %v1818_v5 = vadd.f32 %v2090_v39, %v1673_v3 }
 0x306   :  { %v1678_v41 = vadd.f32 %v2013_v8, %v3190_v2  ;;  %v2014_v42 = vpop.f32.mrb[70].mxu0  ;;  %v2094_v40 = vpop.f32.mrb[70].mxu1  ;;  %1892 = vxpose.xlu0.b32.cont [2/16] (narrow) %v1818_v5, 8 }
 0x307   :  { %v2015_v62 = vpop.f32.mrb[71].mxu0  ;;  %v2095_v45 = vpop.f32.mrb[71].mxu1 }
 0x308   :  { %v2016_v46 = vadd.f32 %v2015_v62, %v2014_v42  ;;  %v2096_v52 = vadd.f32 %v2095_v45, %v2094_v40  ;;  %v1823_v27 = vadd.f32 %v2093_v29, %v1678_v41 }
 0x30a   :  { %v1683_v15 = vadd.f32 %v2016_v46, %v3190_v2  ;;  %v2017_v48 = vpop.f32.mrb[72].mxu0  ;;  %v2097_v54 = vpop.f32.mrb[72].mxu1  ;;  %1893 = vxpose.xlu0.b32.cont [3/16] (narrow) %v1823_v27, 8 }
 0x30b   :  { %v2018_v63 = vpop.f32.mrb[73].mxu0  ;;  %v2098_v56 = vpop.f32.mrb[73].mxu1 }
 0x30c   :  { %v2019_v44 = vadd.f32 %v2018_v63, %v2017_v48  ;;  %v2099_v58 = vadd.f32 %v2098_v56, %v2097_v54  ;;  %v1828_v35 = vadd.f32 %v2096_v52, %v1683_v15 }
 0x30e   :  { %v1688_v28 = vadd.f32 %v2019_v44, %v3190_v2  ;;  %v2020_v0 = vpop.f32.mrb[74].mxu0  ;;  %v2100_v59 = vpop.f32.mrb[74].mxu1  ;;  %1894 = vxpose.xlu0.b32.cont [4/16] (narrow) %v1828_v35, 8 }
 0x30f   :  { %v2021_v4 = vpop.f32.mrb[75].mxu0  ;;  %v2101_v7 = vpop.f32.mrb[75].mxu1 }
 0x310   :  { %v2022_v13 = vadd.f32 %v2021_v4, %v2020_v0  ;;  %v2102_v1 = vadd.f32 %v2101_v7, %v2100_v59  ;;  %v1833_v38 = vadd.f32 %v2099_v58, %v1688_v28 }
 0x312   :  { %v1693_v30 = vadd.f32 %v2022_v13, %v3190_v2  ;;  %v2023_v57 = vpop.f32.mrb[76].mxu0  ;;  %v2103_v61 = vpop.f32.mrb[76].mxu1  ;;  %1895 = vxpose.xlu0.b32.cont [5/16] (narrow) %v1833_v38, 8 }
 0x313   :  { %v2024_v12 = vpop.f32.mrb[77].mxu0  ;;  %v2104_v60 = vpop.f32.mrb[77].mxu1 }
 0x314   :  { %v2025_v55 = vadd.f32 %v2024_v12, %v2023_v57  ;;  %v2105_v43 = vadd.f32 %v2104_v60, %v2103_v61  ;;  %v1838_v6 = vadd.f32 %v2102_v1, %v1693_v30 }
 0x316   :  { %v1698_v9 = vadd.f32 %v2025_v55, %v3190_v2  ;;  %v2026_v51 = vpop.f32.mrb[78].mxu0  ;;  %v2106_v10 = vpop.f32.mrb[78].mxu1  ;;  %1896 = vxpose.xlu0.b32.cont [6/16] (narrow) %v1838_v6, 8 }
 0x317   :  { %v2027_v11 = vpop.f32.mrb[79].mxu0  ;;  %v2107_v33 = vpop.f32.mrb[79].mxu1 }
 0x318   :  { %v2028_v14 = vadd.f32 %v2027_v11, %v2026_v51  ;;  %v2108_v37 = vadd.f32 %v2107_v33, %v2106_v10  ;;  %v1843_v53 = vadd.f32 %v2105_v43, %v1698_v9 }
 0x31a   :  { %v1703_v16 = vadd.f32 %v2028_v14, %v3190_v2  ;;  %v2029_v19 = vpop.f32.mrb[80].mxu0  ;;  %v2109_v49 = vpop.f32.mrb[80].mxu1  ;;  %1897 = vxpose.xlu0.b32.cont [7/16] (narrow) %v1843_v53, 8 }
 0x31b   :  { %v2030_v17 = vpop.f32.mrb[81].mxu0  ;;  %v2110_v50 = vpop.f32.mrb[81].mxu1 }
 0x31c   :  { %v2031_v26 = vadd.f32 %v2030_v17, %v2029_v19  ;;  %v2111_v25 = vadd.f32 %v2110_v50, %v2109_v49  ;;  %v1848_v18 = vadd.f32 %v2108_v37, %v1703_v16 }
 0x31e   :  { %v1708_v21 = vadd.f32 %v2031_v26, %v3190_v2  ;;  %v2032_v24 = vpop.f32.mrb[82].mxu0  ;;  %v2112_v20 = vpop.f32.mrb[82].mxu1  ;;  %1898 = vxpose.xlu0.b32.cont [8/16] (narrow) %v1848_v18, 8 }
 0x31f   :  { %v2033_v31 = vpop.f32.mrb[83].mxu0  ;;  %v2113_v32 = vpop.f32.mrb[83].mxu1 }
 0x320   :  { %v2034_v39 = vadd.f32 %v2033_v31, %v2032_v24  ;;  %v2114_v34 = vadd.f32 %v2113_v32, %v2112_v20  ;;  %v1853_v3 = vadd.f32 %v2111_v25, %v1708_v21 }
 0x322   :  { %v1713_v47 = vadd.f32 %v2034_v39, %v3190_v2  ;;  %v2035_v36 = vpop.f32.mrb[84].mxu0  ;;  %v2115_v23 = vpop.f32.mrb[84].mxu1  ;;  %1899 = vxpose.xlu0.b32.cont [9/16] (narrow) %v1853_v3, 8 }
 0x323   :  { %v2036_v22 = vpop.f32.mrb[85].mxu0  ;;  %v2116_v8 = vpop.f32.mrb[85].mxu1 }
 0x324   :  { %v2037_v29 = vadd.f32 %v2036_v22, %v2035_v36  ;;  %v2117_v5 = vadd.f32 %v2116_v8, %v2115_v23  ;;  %v1858_v41 = vadd.f32 %v2114_v34, %v1713_v47 }
 0x326   :  { %v1718_v42 = vadd.f32 %v2037_v29, %v3190_v2  ;;  %v2038_v40 = vpop.f32.mrb[86].mxu0  ;;  %v2118_v62 = vpop.f32.mrb[86].mxu1  ;;  %1900 = vxpose.xlu0.b32.cont [10/16] (narrow) %v1858_v41, 8 }
 0x327   :  { %v2039_v45 = vpop.f32.mrb[87].mxu0  ;;  %v2119_v46 = vpop.f32.mrb[87].mxu1 }
 0x328   :  { %v2040_v52 = vadd.f32 %v2039_v45, %v2038_v40  ;;  %v2120_v27 = vadd.f32 %v2119_v46, %v2118_v62  ;;  %v1863_v15 = vadd.f32 %v2117_v5, %v1718_v42 }
 0x32a   :  { %v1723_v48 = vadd.f32 %v2040_v52, %v3190_v2  ;;  %v2041_v54 = vpop.f32.mrb[88].mxu0  ;;  %v2121_v63 = vpop.f32.mrb[88].mxu1  ;;  %1901 = vxpose.xlu0.b32.cont [11/16] (narrow) %v1863_v15, 8 }
 0x32b   :  { %v2042_v56 = vpop.f32.mrb[89].mxu0  ;;  %v2122_v44 = vpop.f32.mrb[89].mxu1 }
 0x32c   :  { %v2043_v58 = vadd.f32 %v2042_v56, %v2041_v54  ;;  %v2123_v35 = vadd.f32 %v2122_v44, %v2121_v63  ;;  %v1868_v28 = vadd.f32 %v2120_v27, %v1723_v48 }
 0x32e   :  { %v1728_v0 = vadd.f32 %v2043_v58, %v3190_v2  ;;  %v2044_v59 = vpop.f32.mrb[90].mxu0  ;;  %v2124_v4 = vpop.f32.mrb[90].mxu1  ;;  %1902 = vxpose.xlu0.b32.cont [12/16] (narrow) %v1868_v28, 8 }
 0x32f   :  { %v2045_v7 = vpop.f32.mrb[91].mxu0  ;;  %v2125_v13 = vpop.f32.mrb[91].mxu1 }
 0x330   :  { %v2046_v1 = vadd.f32 %v2045_v7, %v2044_v59  ;;  %v2126_v38 = vadd.f32 %v2125_v13, %v2124_v4  ;;  %v1873_v30 = vadd.f32 %v2123_v35, %v1728_v0 }
 0x332   :  { %v1733_v57 = vadd.f32 %v2046_v1, %v3190_v2  ;;  %v2047_v61 = vpop.f32.mrb[92].mxu0  ;;  %v2127_v12 = vpop.f32.mrb[92].mxu1  ;;  %1903 = vxpose.xlu0.b32.cont [13/16] (narrow) %v1873_v30, 8 }
 0x333   :  { %v2048_v60 = vpop.f32.mrb[93].mxu0  ;;  %v2128_v55 = vpop.f32.mrb[93].mxu1 }
 0x334   :  { %v2049_v43 = vadd.f32 %v2048_v60, %v2047_v61  ;;  %v2129_v6 = vadd.f32 %v2128_v55, %v2127_v12  ;;  %v1878_v9 = vadd.f32 %v2126_v38, %v1733_v57 }
 0x336   :  { %v1738_v51 = vadd.f32 %v2049_v43, %v3190_v2  ;;  %v2050_v10 = vpop.f32.mrb[94].mxu0  ;;  %v2130_v11 = vpop.f32.mrb[94].mxu1  ;;  %1904 = vxpose.xlu0.b32.cont [14/16] (narrow) %v1878_v9, 8 }
 0x337   :  { %v2051_v33 = vpop.f32.mrb[95].mxu0  ;;  %v2131_v14 = vpop.f32.mrb[95].mxu1 }
 0x338   :  { %v2052_v37 = vadd.f32 %v2051_v33, %v2050_v10  ;;  %v2132_v53 = vadd.f32 %v2131_v14, %v2130_v11  ;;  %v1883_v16 = vadd.f32 %v2129_v6, %v1738_v51 }
 0x33a   :  { %v1743_v19 = vadd.f32 %v2052_v37, %v3190_v2  ;;  %1905 = vxpose.xlu0.b32.cont [15/16] (narrow) %v1883_v16, 8 }
 0x33c   :  { %v1888_v49 = vadd.f32 %v2132_v53, %v1743_v19 }
 0x33e   :  { %1906 = vxpose.xlu0.b32.end [16/16] (narrow) %v1888_v49, 8 }
 0x382   :  { %v1907_v17 = vpop.trf.xlu0 }
 0x383   :  { %1923 = vst [vmem:[#allocation7] sm:$0xff] %v1907_v17 }
 0x384   :  { %2660 = shalt.err (!%p2657_p6)
}
 0x385   :  { %s2661_s23 = scalar_lea.hbm %s3227_s7, 128 }
 0x386   :  { %p2662_p7 = scmp.ne.s32.totalorder %s3227_s7, %s2661_s23  ;;  %p2665_p8 = scmp.lt.u32.totalorder %s2661_s23, %s3227_s7 }
 0x388   :  { %p2667_p9 = pnand %p2665_p8, %p2662_p7 }
 0x38a   :  { %2670 = shalt.err (!%p2667_p9)
}
 0x38b   :  { %1933 = dma.vmem_to_hbm [thread:$0]  %s1931_s19, 128, %s3227_s7, [#allocation4]  }
 0x38c   :  { %2675 = dma.done.wait [#allocation4], 128  }
 0x38d   :  { %2676 = vsyncadd [#allocation4], 4294967168 }
 0x38e   :  { %1937 = vsyncpa [#allocation3], 1 }
 0x38f   :  { %1938 = vsyncpa [#allocation6], 1 }
 0x390   :  { %1939 = vsyncpa [#allocation4], 1 }

</bundles_post_ra>
